<compile_context>
chip_gen: v6e
topology: v6e:2x2x1
jax: 0.10.0
libtpu: 0.0.40
codegen_flags: <defaults>
</compile_context>

<pallas_src>
import jax
import jax.numpy as jnp
from jax.experimental import pallas as pl
from jax.experimental.pallas import tpu as pltpu

# ----------------------------- model config ---------------------------------
BATCH = 2
SEQ = 8
HIDDEN = 32
NUM_HEADS = 2
HEAD_DIM = HIDDEN // NUM_HEADS
FFN = 64
NUM_LAYERS = 2
VOCAB = 30
TYPE_VOCAB = 2
NUM_LABELS = 3
LABELS_PAD = 128                    # lane-dense classifier width (sliced in wrapper)
PACK_W = 128                        # lane width of the packed vector operand
LN_EPS = 1e-12
MASK_BIAS = -1e4                    # HF legacy additive-mask constant (fine in f32)
TOKENS = BATCH * SEQ

# ---- packed-operand row layout (all small vectors + attn bias + cls weight) ----
# row 0,1                : embedding LayerNorm gamma / beta
# rows 2 + 8*l .. +7     : [bqkv | bo | ln1_g | ln1_b | b1 | b2 | ln2_g | ln2_b]
POOLER_B_ROW = 2 + 8 * NUM_LAYERS               # pooler bias row
CLSB_ROW = POOLER_B_ROW + 1                     # (padded) classifier bias row
VEC_ROWS = CLSB_ROW + 1                         # number of "vector" rows
ABIAS_ROW = ((VEC_ROWS + 7) // 8) * 8           # sublane-aligned start of attn bias
WC_ROW = ABIAS_ROW + NUM_HEADS * TOKENS         # sublane-aligned start of cls weight
NPACK = WC_ROW + HIDDEN                         # total packed rows


# ------------------------------ shared math ----------------------------------
def _layer_norm(x, gamma, beta, eps=LN_EPS):
    mu = jnp.mean(x, axis=-1, keepdims=True)
    var = jnp.mean((x - mu) ** 2, axis=-1, keepdims=True)
    return (x - mu) * jax.lax.rsqrt(var + eps) * gamma + beta


def _gelu(x):
    # TODO(synk): HF Bert's default is exact erf GELU; the tanh approximation is
    # kept for a guaranteed Mosaic lowering (small numeric drift vs PyTorch).
    return jax.nn.gelu(x, approximate=True)


# ------------------------------ fused kernel ---------------------------------
def bert_fused_kernel(x_ref, pack_ref, wqkv_ref, wsq_ref, w1_ref, w2_ref, lab_ref,
                      logits_ref, loss_ref):
    f32 = jnp.float32
    scale = 1.0 / (HEAD_DIM ** 0.5)

    # Hoisted head lane masks (computed once, reused by every layer).
    lane = jax.lax.broadcasted_iota(jnp.int32, (1, HIDDEN), 1)
    hms = [((lane >= h * HEAD_DIM) & (lane < (h + 1) * HEAD_DIM)).astype(f32)
           for h in range(NUM_HEADS)]

    # Hoisted head-stacked additive attention bias (padding mask + cross-batch
    # block-diagonal term), shape (NUM_HEADS*TOKENS, TOKENS).
    attn_bias = pack_ref[ABIAS_ROW:ABIAS_ROW + NUM_HEADS * TOKENS, 0:TOKENS]

    # ---- embedding LayerNorm over the whole batch as (B*S, H) rows ----
    x = _layer_norm(x_ref[...], pack_ref[0:1, 0:HIDDEN], pack_ref[1:2, 0:HIDDEN])

    for l in range(NUM_LAYERS):                 # static unroll; weights stay in VMEM
        base = 2 + 8 * l
        bqkv = pack_ref[base + 0:base + 1, 0:3 * HIDDEN]
        bo   = pack_ref[base + 1:base + 2, 0:HIDDEN]
        g1   = pack_ref[base + 2:base + 3, 0:HIDDEN]
        be1  = pack_ref[base + 3:base + 4, 0:HIDDEN]
        b1   = pack_ref[base + 4:base + 5, 0:FFN]
        b2   = pack_ref[base + 5:base + 6, 0:HIDDEN]
        g2   = pack_ref[base + 6:base + 7, 0:HIDDEN]
        be2  = pack_ref[base + 7:base + 8, 0:HIDDEN]

        # Fused QKV projection: one matmul + one bias add for all of q, k, v.
        qkv = jnp.dot(x, wqkv_ref[l], preferred_element_type=f32) + bqkv   # (T, 3H)
        q = qkv[:, 0:HIDDEN] * scale
        k = qkv[:, HIDDEN:2 * HIDDEN]
        v = qkv[:, 2 * HIDDEN:3 * HIDDEN]

        # Both heads batched along sublanes: rows [h*T:(h+1)*T] carry head h's
        # lane-masked queries, so (q_h . k_h) == ((q*hm_h) . k) exactly.
        q_st = jnp.concatenate([q * hm for hm in hms], axis=0)            # (2T, H)
        scores = jnp.einsum('qd,kd->qk', q_st, k,
                            preferred_element_type=f32) + attn_bias       # (2T, T)
        m = jnp.max(scores, axis=-1, keepdims=True)
        e = jnp.exp(scores - m)
        probs = e * pl.reciprocal(jnp.sum(e, axis=-1, keepdims=True), approx=True)

        # One probs@V; per-head context recovered by masking the full-width
        # result to each head's (disjoint) hidden lanes and adding.
        ctx_st = jnp.dot(probs, v, preferred_element_type=f32)            # (2T, H)
        ctx = ctx_st[0:TOKENS, :] * hms[0]
        for h in range(1, NUM_HEADS):
            ctx = ctx + ctx_st[h * TOKENS:(h + 1) * TOKENS, :] * hms[h]

        attn_out = jnp.dot(ctx, wsq_ref[l], preferred_element_type=f32) + bo
        y = _layer_norm(x + attn_out, g1, be1)

        h1 = _gelu(jnp.dot(y, w1_ref[l], preferred_element_type=f32) + b1)
        h2 = jnp.dot(h1, w2_ref[l], preferred_element_type=f32) + b2
        x = _layer_norm(y + h2, g2, be2)

    # ---- pooler + classifier (CLS token), gather-free row selection ----
    tok = jax.lax.broadcasted_iota(jnp.int32, (BATCH, TOKENS), 1)
    brow = jax.lax.broadcasted_iota(jnp.int32, (BATCH, TOKENS), 0)
    cls_sel = (tok == brow * SEQ).astype(f32)                             # (B, T)
    cls = jnp.dot(cls_sel, x, preferred_element_type=f32)                 # (B, H)

    pooler_b = pack_ref[POOLER_B_ROW:POOLER_B_ROW + 1, 0:HIDDEN]
    pooled = jnp.tanh(jnp.dot(cls, wsq_ref[NUM_LAYERS],
                              preferred_element_type=f32) + pooler_b)

    wc = pack_ref[WC_ROW:WC_ROW + HIDDEN, :]                              # (H, 128)
    cls_b = pack_ref[CLSB_ROW:CLSB_ROW + 1, :]                            # (1, 128)
    logits = jnp.dot(pooled, wc, preferred_element_type=f32) + cls_b      # (B, 128)
    logits_ref[...] = logits

    # ---- cross-entropy (single_label_classification), padded lanes masked ----
    col = jax.lax.broadcasted_iota(jnp.int32, (BATCH, LABELS_PAD), 1)
    rowi = jax.lax.broadcasted_iota(jnp.int32, (BATCH, LABELS_PAD), 0)
    valid = col < NUM_LABELS
    masked = jnp.where(valid, logits, -1e30)
    mx = jnp.max(masked, axis=-1, keepdims=True)
    lse = mx + jnp.log(jnp.sum(jnp.exp(masked - mx), axis=-1, keepdims=True))

    # labels come from SMEM (2 scalars) and are broadcast per batch row.
    lab_bc = jnp.zeros((BATCH, LABELS_PAD), jnp.int32)
    for b in range(BATCH):
        lab_bc = jnp.where(rowi == b, lab_ref[b], lab_bc)
    onehot = (col == lab_bc).astype(f32)
    target = jnp.sum(onehot * logits, axis=-1, keepdims=True)
    loss_ref[...] = jnp.sum(lse - target, axis=0, keepdims=True) * (1.0 / BATCH)


# ------------------------------ forward wrapper -------------------------------
@jax.jit
def quant_bert_forward(params, input_ids, attention_mask, token_type_ids, labels):
    B, S = input_ids.shape
    # Embedding lookups (gather) are plain-JAX glue; flatten to (B*S, H) here so
    # the kernel never reshapes across sublane tiles.
    emb = (params["word_emb"][input_ids]
           + params["pos_emb"][jnp.arange(S)][None, :, :]
           + params["type_emb"][token_type_ids]).astype(jnp.float32)
    emb2d = emb.reshape(B * S, HIDDEN)

    layers = params["layers"]
    # Fused / stacked weights: (L,H,3H) QKV, (L+1,H,H) [Wo..., pooler_w],
    # (L,H,FFN) W1, (L,FFN,H) W2.
    wqkv = jnp.stack([jnp.concatenate([lw["wq"], lw["wk"], lw["wv"]], axis=-1)
                      for lw in layers])
    wsq = jnp.stack([lw["wo"] for lw in layers] + [params["pooler_w"]])
    w1 = jnp.stack([lw["w1"] for lw in layers])
    w2 = jnp.stack([lw["w2"] for lw in layers])

    # ---- single lane-dense packed operand: vectors + attn bias + cls weight ----
    def _row(v):
        v = jnp.asarray(v, jnp.float32).reshape(1, -1)
        return jnp.pad(v, ((0, 0), (0, PACK_W - v.shape[1])))

    vec_rows = [_row(params["emb_ln_g"]), _row(params["emb_ln_b"])]
    for lw in layers:
        vec_rows += [
            _row(jnp.concatenate([lw["bq"], lw["bk"], lw["bv"]], axis=-1)),
            _row(lw["bo"]), _row(lw["ln1_g"]), _row(lw["ln1_b"]),
            _row(lw["b1"]), _row(lw["b2"]), _row(lw["ln2_g"]), _row(lw["ln2_b"])]
    vec_rows += [_row(params["pooler_b"]), _row(params["cls_b"])]
    vecs = jnp.concatenate(vec_rows, axis=0)                              # (VEC_ROWS,128)

    # Block-diagonal additive attention bias over the flattened 16 tokens:
    # within-batch entries follow the HF padding mask, cross-batch entries get a
    # large negative constant (exp underflows to 0 after max subtraction).
    mask = attention_mask.astype(jnp.float32).reshape(B * S)
    batch_of = jnp.arange(B * S) // S
    same = batch_of[:, None] == batch_of[None, :]
    bias16 = jnp.where(same, (1.0 - mask)[None, :] * MASK_BIAS, 2.0 * MASK_BIAS)
    bias_st = jnp.pad(jnp.tile(bias16, (NUM_HEADS, 1)),
                      ((0, 0), (0, PACK_W - B * S)))                      # (2T,128)

    wc_pad = jnp.pad(params["cls_w"],
                     ((0, 0), (0, PACK_W - NUM_LABELS)))                  # (H,128)

    pad_rows = jnp.zeros((ABIAS_ROW - vecs.shape[0], PACK_W), jnp.float32)
    pack = jnp.concatenate([vecs, pad_rows, bias_st, wc_pad], axis=0)     # (NPACK,128)

    labels1d = labels.astype(jnp.int32).reshape(B)                        # SMEM scalars

    logits_pad, loss = pl.pallas_call(
        bert_fused_kernel,
        out_shape=(jax.ShapeDtypeStruct((B, LABELS_PAD), jnp.float32),
                   jax.ShapeDtypeStruct((1, 1), jnp.float32)),
        in_specs=[pl.BlockSpec(memory_space=pltpu.MemorySpace.VMEM)] * 6
                 + [pl.BlockSpec(memory_space=pltpu.MemorySpace.SMEM)],
        out_specs=(pl.BlockSpec(memory_space=pltpu.MemorySpace.VMEM),
                   pl.BlockSpec(memory_space=pltpu.MemorySpace.VMEM)),
    )(emb2d, pack, wqkv, wsq, w1, w2, labels1d)

    # TODO(synk): QAT fake-quant observers of the wrapped model are not modeled;
    # this implements the float forward + classification loss.
    return {"loss": loss[0, 0], "logits": logits_pad[:, :NUM_LABELS]}


# ------------------------------ plain-JAX reference ---------------------------
def reference_forward(params, input_ids, attention_mask, token_type_ids, labels):
    P = jax.lax.Precision.HIGHEST
    S = input_ids.shape[1]
    emb = (params["word_emb"][input_ids]
           + params["pos_emb"][jnp.arange(S)][None, :, :]
           + params["type_emb"][token_type_ids]).astype(jnp.float32)
    x = _layer_norm(emb, params["emb_ln_g"], params["emb_ln_b"])
    bias = ((1.0 - attention_mask.astype(jnp.float32)) * MASK_BIAS)[:, None, None, :]
    for lw in params["layers"]:
        q = jnp.einsum('bsh,hk->bsk', x, lw["wq"], precision=P) + lw["bq"]
        k = jnp.einsum('bsh,hk->bsk', x, lw["wk"], precision=P) + lw["bk"]
        v = jnp.einsum('bsh,hk->bsk', x, lw["wv"], precision=P) + lw["bv"]
        split = lambda t: t.reshape(BATCH, S, NUM_HEADS, HEAD_DIM).transpose(0, 2, 1, 3)
        qh, kh, vh = split(q), split(k), split(v)
        scores = (jnp.einsum('bnqd,bnkd->bnqk', qh, kh, precision=P)
                  / (HEAD_DIM ** 0.5) + bias)
        probs = jax.nn.softmax(scores, axis=-1)
        ctx = jnp.einsum('bnqk,bnkd->bnqd', probs, vh, precision=P)
        ctx = ctx.transpose(0, 2, 1, 3).reshape(BATCH, S, HIDDEN)
        attn = jnp.einsum('bsh,hk->bsk', ctx, lw["wo"], precision=P) + lw["bo"]
        y = _layer_norm(x + attn, lw["ln1_g"], lw["ln1_b"])
        h1 = _gelu(jnp.einsum('bsh,hf->bsf', y, lw["w1"], precision=P) + lw["b1"])
        h2 = jnp.einsum('bsf,fh->bsh', h1, lw["w2"], precision=P) + lw["b2"]
        x = _layer_norm(y + h2, lw["ln2_g"], lw["ln2_b"])
    cls = x[:, 0, :]
    pooled = jnp.tanh(jnp.dot(cls, params["pooler_w"], precision=P)
                      + params["pooler_b"])
    logits = jnp.dot(pooled, params["cls_w"], precision=P) + params["cls_b"]
    logp = jax.nn.log_softmax(logits, axis=-1)
    loss = -jnp.mean(logp[jnp.arange(logits.shape[0]), labels.astype(jnp.int32)])
    return {"loss": loss, "logits": logits}


# ------------------------------ parameter init --------------------------------
def init_params(key):
    def nrm(k, shape, scale=0.02):
        return (scale * jax.random.normal(k, shape)).astype(jnp.float32)

    keys = iter(jax.random.split(key, 8 + NUM_LAYERS * 8))
    params = {
        "word_emb": nrm(next(keys), (VOCAB, HIDDEN)),
        "pos_emb": nrm(next(keys), (SEQ, HIDDEN)),
        "type_emb": nrm(next(keys), (TYPE_VOCAB, HIDDEN)),
        "emb_ln_g": jnp.ones((1, HIDDEN), jnp.float32),
        "emb_ln_b": jnp.zeros((1, HIDDEN), jnp.float32),
        "pooler_w": nrm(next(keys), (HIDDEN, HIDDEN)),
        "pooler_b": jnp.zeros((1, HIDDEN), jnp.float32),
        "cls_w": nrm(next(keys), (HIDDEN, NUM_LABELS)),
        "cls_b": jnp.zeros((1, NUM_LABELS), jnp.float32),
        "layers": [],
    }
    for _ in range(NUM_LAYERS):
        params["layers"].append({
            "wq": nrm(next(keys), (HIDDEN, HIDDEN)),
            "bq": jnp.zeros((1, HIDDEN), jnp.float32),
            "wk": nrm(next(keys), (HIDDEN, HIDDEN)),
            "bk": jnp.zeros((1, HIDDEN), jnp.float32),
            "wv": nrm(next(keys), (HIDDEN, HIDDEN)),
            "bv": jnp.zeros((1, HIDDEN), jnp.float32),
            "wo": nrm(next(keys), (HIDDEN, HIDDEN)),
            "bo": jnp.zeros((1, HIDDEN), jnp.float32),
            "ln1_g": jnp.ones((1, HIDDEN), jnp.float32),
            "ln1_b": jnp.zeros((1, HIDDEN), jnp.float32),
            "w1": nrm(next(keys), (HIDDEN, FFN)),
            "b1": jnp.zeros((1, FFN), jnp.float32),
            "w2": nrm(next(keys), (FFN, HIDDEN)),
            "b2": jnp.zeros((1, HIDDEN), jnp.float32),
            "ln2_g": jnp.ones((1, HIDDEN), jnp.float32),
            "ln2_b": jnp.zeros((1, HIDDEN), jnp.float32),
        })
    return params


# ------------------------------ main ------------------------------------------
if __name__ == "__main__":
    root = jax.random.PRNGKey(0)
    k_param, k_ids, k_lab = jax.random.split(root, 3)

    params = init_params(k_param)
    input_ids = jax.random.randint(k_ids, (BATCH, SEQ), 0, VOCAB, dtype=jnp.int32)
    attention_mask = jnp.ones((BATCH, SEQ), jnp.int32)
    token_type_ids = jnp.zeros((BATCH, SEQ), jnp.int32)
    labels = jax.random.randint(k_lab, (BATCH,), 0, NUM_LABELS, dtype=jnp.int32)

    out = quant_bert_forward(params, input_ids, attention_mask,
                             token_type_ids, labels)
    jax.block_until_ready(out)

    assert out["logits"].shape == (BATCH, NUM_LABELS)
    assert out["loss"].shape == ()

    ref = reference_forward(params, input_ids, attention_mask,
                            token_type_ids, labels)
    # Tolerance slightly above the previous exact-division version to cover the
    # EUP approximate reciprocal now used in the attention softmax.
    assert jnp.allclose(out["logits"], ref["logits"], atol=2e-4, rtol=2e-3), \
        (out["logits"], ref["logits"])
    assert jnp.allclose(out["loss"], ref["loss"], atol=2e-4, rtol=2e-3), \
        (out["loss"], ref["loss"])

    print("KERNEL_OK")
</pallas_src>

<mosaic_0001>
module attributes {stable_mosaic.version = 11 : i64} {
  func.func @bert_fused_kernel(%arg0: memref<16x32xf32, #tpu.memory_space<vmem>>, %arg1: memref<88x128xf32, #tpu.memory_space<vmem>>, %arg2: memref<2x32x96xf32, #tpu.memory_space<vmem>>, %arg3: memref<3x32x32xf32, #tpu.memory_space<vmem>>, %arg4: memref<2x32x64xf32, #tpu.memory_space<vmem>>, %arg5: memref<2x64x32xf32, #tpu.memory_space<vmem>>, %arg6: memref<2xi32, #tpu.memory_space<smem>>, %arg7: memref<2x128xf32, #tpu.memory_space<vmem>>, %arg8: memref<1x1xf32, #tpu.memory_space<vmem>>) attributes {dimension_semantics = [], scalar_prefetch = 0 : i64, scratch_operands = 0 : i64, tpu.core_type = #tpu.core_type<tc>} {
    %0 = tpu.iota {dimensions = array<i32: 1>} : vector<1x32xi32>
    %c0_i32 = arith.constant 0 : i32
    %1 = vector.broadcast %c0_i32 : i32 to vector<1x32xi32>
    %2 = arith.cmpi sge, %0, %1 : vector<1x32xi32>
    %c16_i32 = arith.constant 16 : i32
    %3 = vector.broadcast %c16_i32 : i32 to vector<1x32xi32>
    %4 = arith.cmpi slt, %0, %3 : vector<1x32xi32>
    %5 = arith.andi %2, %4 : vector<1x32xi1>
    %6 = arith.extui %5 : vector<1x32xi1> to vector<1x32xi32>
    %7 = arith.sitofp %6 : vector<1x32xi32> to vector<1x32xf32>
    %c16_i32_0 = arith.constant 16 : i32
    %8 = vector.broadcast %c16_i32_0 : i32 to vector<1x32xi32>
    %9 = arith.cmpi sge, %0, %8 : vector<1x32xi32>
    %c32_i32 = arith.constant 32 : i32
    %10 = vector.broadcast %c32_i32 : i32 to vector<1x32xi32>
    %11 = arith.cmpi slt, %0, %10 : vector<1x32xi32>
    %12 = arith.andi %9, %11 : vector<1x32xi1>
    %13 = arith.extui %12 : vector<1x32xi1> to vector<1x32xi32>
    %14 = arith.sitofp %13 : vector<1x32xi32> to vector<1x32xf32>
    %c24 = arith.constant 24 : index
    %c0 = arith.constant 0 : index
    %15 = vector.load %arg1[%c24, %c0] : memref<88x128xf32, #tpu.memory_space<vmem>>, vector<32x16xf32>
    %c0_1 = arith.constant 0 : index
    %c0_2 = arith.constant 0 : index
    %16 = vector.load %arg0[%c0_1, %c0_2] : memref<16x32xf32, #tpu.memory_space<vmem>>, vector<16x32xf32>
    %c0_3 = arith.constant 0 : index
    %c0_4 = arith.constant 0 : index
    %17 = vector.load %arg1[%c0_3, %c0_4] : memref<88x128xf32, #tpu.memory_space<vmem>>, vector<1x32xf32>
    %c1 = arith.constant 1 : index
    %c0_5 = arith.constant 0 : index
    %18 = vector.load %arg1[%c1, %c0_5] : memref<88x128xf32, #tpu.memory_space<vmem>>, vector<1x32xf32>
    %cst = arith.constant dense<0.000000e+00> : vector<16xf32>
    %19 = vector.multi_reduction <add>, %16, %cst [1] : vector<16x32xf32> to vector<16xf32>
    %20 = vector.shape_cast %19 : vector<16xf32> to vector<16x1xf32>
    %cst_6 = arith.constant 3.200000e+01 : f32
    %21 = vector.broadcast %cst_6 : f32 to vector<16x1xf32>
    %22 = arith.divf %20, %21 : vector<16x1xf32>
    %23 = vector.broadcast %22 : vector<16x1xf32> to vector<16x32xf32>
    %24 = arith.subf %16, %23 : vector<16x32xf32>
    %25 = arith.mulf %24, %24 : vector<16x32xf32>
    %cst_7 = arith.constant dense<0.000000e+00> : vector<16xf32>
    %26 = vector.multi_reduction <add>, %25, %cst_7 [1] : vector<16x32xf32> to vector<16xf32>
    %27 = vector.shape_cast %26 : vector<16xf32> to vector<16x1xf32>
    %cst_8 = arith.constant 3.200000e+01 : f32
    %28 = vector.broadcast %cst_8 : f32 to vector<16x1xf32>
    %29 = arith.divf %27, %28 : vector<16x1xf32>
    %30 = vector.broadcast %22 : vector<16x1xf32> to vector<16x32xf32>
    %31 = arith.subf %16, %30 : vector<16x32xf32>
    %cst_9 = arith.constant 9.99999996E-13 : f32
    %32 = vector.broadcast %cst_9 : f32 to vector<16x1xf32>
    %33 = arith.addf %29, %32 : vector<16x1xf32>
    %34 = math.rsqrt %33 : vector<16x1xf32>
    %35 = vector.broadcast %34 : vector<16x1xf32> to vector<16x32xf32>
    %36 = arith.mulf %31, %35 : vector<16x32xf32>
    %37 = vector.broadcast %17 : vector<1x32xf32> to vector<16x32xf32>
    %38 = arith.mulf %36, %37 : vector<16x32xf32>
    %39 = vector.broadcast %18 : vector<1x32xf32> to vector<16x32xf32>
    %40 = arith.addf %38, %39 : vector<16x32xf32>
    %c2 = arith.constant 2 : index
    %c0_10 = arith.constant 0 : index
    %41 = vector.load %arg1[%c2, %c0_10] : memref<88x128xf32, #tpu.memory_space<vmem>>, vector<1x96xf32>
    %c3 = arith.constant 3 : index
    %c0_11 = arith.constant 0 : index
    %42 = vector.load %arg1[%c3, %c0_11] : memref<88x128xf32, #tpu.memory_space<vmem>>, vector<1x32xf32>
    %c4 = arith.constant 4 : index
    %c0_12 = arith.constant 0 : index
    %43 = vector.load %arg1[%c4, %c0_12] : memref<88x128xf32, #tpu.memory_space<vmem>>, vector<1x32xf32>
    %c5 = arith.constant 5 : index
    %c0_13 = arith.constant 0 : index
    %44 = vector.load %arg1[%c5, %c0_13] : memref<88x128xf32, #tpu.memory_space<vmem>>, vector<1x32xf32>
    %c6 = arith.constant 6 : index
    %c0_14 = arith.constant 0 : index
    %45 = vector.load %arg1[%c6, %c0_14] : memref<88x128xf32, #tpu.memory_space<vmem>>, vector<1x64xf32>
    %c7 = arith.constant 7 : index
    %c0_15 = arith.constant 0 : index
    %46 = vector.load %arg1[%c7, %c0_15] : memref<88x128xf32, #tpu.memory_space<vmem>>, vector<1x32xf32>
    %c8 = arith.constant 8 : index
    %c0_16 = arith.constant 0 : index
    %47 = vector.load %arg1[%c8, %c0_16] : memref<88x128xf32, #tpu.memory_space<vmem>>, vector<1x32xf32>
    %c9 = arith.constant 9 : index
    %c0_17 = arith.constant 0 : index
    %48 = vector.load %arg1[%c9, %c0_17] : memref<88x128xf32, #tpu.memory_space<vmem>>, vector<1x32xf32>
    %c0_18 = arith.constant 0 : index
    %c0_19 = arith.constant 0 : index
    %c0_20 = arith.constant 0 : index
    %49 = vector.load %arg2[%c0_18, %c0_19, %c0_20] : memref<2x32x96xf32, #tpu.memory_space<vmem>>, vector<1x32x96xf32>
    %50 = vector.shape_cast %49 : vector<1x32x96xf32> to vector<32x96xf32>
    %cst_21 = arith.constant dense<0.000000e+00> : vector<16x96xf32>
    %51 = tpu.matmul %40, %50, %cst_21 {dimension_numbers = #tpu.dot_dimension_numbers<[1], [0], [0], [1], [0, 0, 1, 1], [], []>} : vector<16x32xf32>, vector<32x96xf32>, vector<16x96xf32> -> vector<16x96xf32>
    %52 = vector.broadcast %41 : vector<1x96xf32> to vector<16x96xf32>
    %53 = arith.addf %51, %52 : vector<16x96xf32>
    %54 = vector.extract_strided_slice %53 {offsets = [0, 0], sizes = [16, 32], strides = [1, 1]} : vector<16x96xf32> to vector<16x32xf32>
    %cst_22 = arith.constant 2.500000e-01 : f32
    %55 = vector.broadcast %cst_22 : f32 to vector<16x32xf32>
    %56 = arith.mulf %54, %55 : vector<16x32xf32>
    %57 = vector.extract_strided_slice %53 {offsets = [0, 32], sizes = [16, 32], strides = [1, 1]} : vector<16x96xf32> to vector<16x32xf32>
    %58 = vector.extract_strided_slice %53 {offsets = [0, 64], sizes = [16, 32], strides = [1, 1]} : vector<16x96xf32> to vector<16x32xf32>
    %59 = vector.broadcast %7 : vector<1x32xf32> to vector<16x32xf32>
    %60 = arith.mulf %56, %59 : vector<16x32xf32>
    %61 = vector.broadcast %14 : vector<1x32xf32> to vector<16x32xf32>
    %62 = arith.mulf %56, %61 : vector<16x32xf32>
    %63 = tpu.concatenate %60, %62 in 0 : vector<16x32xf32>, vector<16x32xf32> -> vector<32x32xf32>
    "tpu.trace_start"() <{level = 10 : i32, message = "qd,kd->qk"}> : () -> ()
    %cst_23 = arith.constant dense<0.000000e+00> : vector<32x16xf32>
    %64 = tpu.matmul %63, %57, %cst_23 {dimension_numbers = #tpu.dot_dimension_numbers<[1], [1], [0], [0], [0, 0, 1, 0], [], []>} : vector<32x32xf32>, vector<16x32xf32>, vector<32x16xf32> -> vector<32x16xf32>
    "tpu.trace_stop"() : () -> ()
    %65 = arith.addf %64, %15 : vector<32x16xf32>
    %cst_24 = arith.constant dense<0xFF800000> : vector<32xf32>
    %66 = vector.multi_reduction <maximumf>, %65, %cst_24 [1] : vector<32x16xf32> to vector<32xf32>
    %67 = vector.shape_cast %66 : vector<32xf32> to vector<32x1xf32>
    %68 = vector.broadcast %67 : vector<32x1xf32> to vector<32x16xf32>
    %69 = arith.subf %65, %68 : vector<32x16xf32>
    %70 = math.exp %69 : vector<32x16xf32>
    %cst_25 = arith.constant dense<0.000000e+00> : vector<32xf32>
    %71 = vector.multi_reduction <add>, %70, %cst_25 [1] : vector<32x16xf32> to vector<32xf32>
    %72 = vector.shape_cast %71 : vector<32xf32> to vector<32x1xf32>
    %73 = tpu.reciprocal %72 {approx = true} : vector<32x1xf32> -> vector<32x1xf32>
    %74 = vector.broadcast %73 : vector<32x1xf32> to vector<32x16xf32>
    %75 = arith.mulf %70, %74 : vector<32x16xf32>
    %cst_26 = arith.constant dense<0.000000e+00> : vector<32x32xf32>
    %76 = tpu.matmul %75, %58, %cst_26 {dimension_numbers = #tpu.dot_dimension_numbers<[1], [0], [0], [1], [0, 0, 1, 1], [], []>} : vector<32x16xf32>, vector<16x32xf32>, vector<32x32xf32> -> vector<32x32xf32>
    %77 = vector.extract_strided_slice %76 {offsets = [0, 0], sizes = [16, 32], strides = [1, 1]} : vector<32x32xf32> to vector<16x32xf32>
    %78 = vector.broadcast %7 : vector<1x32xf32> to vector<16x32xf32>
    %79 = arith.mulf %77, %78 : vector<16x32xf32>
    %80 = vector.extract_strided_slice %76 {offsets = [16, 0], sizes = [16, 32], strides = [1, 1]} : vector<32x32xf32> to vector<16x32xf32>
    %81 = vector.broadcast %14 : vector<1x32xf32> to vector<16x32xf32>
    %82 = arith.mulf %80, %81 : vector<16x32xf32>
    %83 = arith.addf %79, %82 : vector<16x32xf32>
    %c0_27 = arith.constant 0 : index
    %c0_28 = arith.constant 0 : index
    %c0_29 = arith.constant 0 : index
    %84 = vector.load %arg3[%c0_27, %c0_28, %c0_29] : memref<3x32x32xf32, #tpu.memory_space<vmem>>, vector<1x32x32xf32>
    %85 = vector.shape_cast %84 : vector<1x32x32xf32> to vector<32x32xf32>
    %cst_30 = arith.constant dense<0.000000e+00> : vector<16x32xf32>
    %86 = tpu.matmul %83, %85, %cst_30 {dimension_numbers = #tpu.dot_dimension_numbers<[1], [0], [0], [1], [0, 0, 1, 1], [], []>} : vector<16x32xf32>, vector<32x32xf32>, vector<16x32xf32> -> vector<16x32xf32>
    %87 = vector.broadcast %42 : vector<1x32xf32> to vector<16x32xf32>
    %88 = arith.addf %86, %87 : vector<16x32xf32>
    %89 = arith.addf %40, %88 : vector<16x32xf32>
    %cst_31 = arith.constant dense<0.000000e+00> : vector<16xf32>
    %90 = vector.multi_reduction <add>, %89, %cst_31 [1] : vector<16x32xf32> to vector<16xf32>
    %91 = vector.shape_cast %90 : vector<16xf32> to vector<16x1xf32>
    %cst_32 = arith.constant 3.200000e+01 : f32
    %92 = vector.broadcast %cst_32 : f32 to vector<16x1xf32>
    %93 = arith.divf %91, %92 : vector<16x1xf32>
    %94 = vector.broadcast %93 : vector<16x1xf32> to vector<16x32xf32>
    %95 = arith.subf %89, %94 : vector<16x32xf32>
    %96 = arith.mulf %95, %95 : vector<16x32xf32>
    %cst_33 = arith.constant dense<0.000000e+00> : vector<16xf32>
    %97 = vector.multi_reduction <add>, %96, %cst_33 [1] : vector<16x32xf32> to vector<16xf32>
    %98 = vector.shape_cast %97 : vector<16xf32> to vector<16x1xf32>
    %cst_34 = arith.constant 3.200000e+01 : f32
    %99 = vector.broadcast %cst_34 : f32 to vector<16x1xf32>
    %100 = arith.divf %98, %99 : vector<16x1xf32>
    %101 = vector.broadcast %93 : vector<16x1xf32> to vector<16x32xf32>
    %102 = arith.subf %89, %101 : vector<16x32xf32>
    %cst_35 = arith.constant 9.99999996E-13 : f32
    %103 = vector.broadcast %cst_35 : f32 to vector<16x1xf32>
    %104 = arith.addf %100, %103 : vector<16x1xf32>
    %105 = math.rsqrt %104 : vector<16x1xf32>
    %106 = vector.broadcast %105 : vector<16x1xf32> to vector<16x32xf32>
    %107 = arith.mulf %102, %106 : vector<16x32xf32>
    %108 = vector.broadcast %43 : vector<1x32xf32> to vector<16x32xf32>
    %109 = arith.mulf %107, %108 : vector<16x32xf32>
    %110 = vector.broadcast %44 : vector<1x32xf32> to vector<16x32xf32>
    %111 = arith.addf %109, %110 : vector<16x32xf32>
    %c0_36 = arith.constant 0 : index
    %c0_37 = arith.constant 0 : index
    %c0_38 = arith.constant 0 : index
    %112 = vector.load %arg4[%c0_36, %c0_37, %c0_38] : memref<2x32x64xf32, #tpu.memory_space<vmem>>, vector<1x32x64xf32>
    %113 = vector.shape_cast %112 : vector<1x32x64xf32> to vector<32x64xf32>
    %cst_39 = arith.constant dense<0.000000e+00> : vector<16x64xf32>
    %114 = tpu.matmul %111, %113, %cst_39 {dimension_numbers = #tpu.dot_dimension_numbers<[1], [0], [0], [1], [0, 0, 1, 1], [], []>} : vector<16x32xf32>, vector<32x64xf32>, vector<16x64xf32> -> vector<16x64xf32>
    %115 = vector.broadcast %45 : vector<1x64xf32> to vector<16x64xf32>
    %116 = arith.addf %114, %115 : vector<16x64xf32>
    %117 = arith.mulf %116, %116 : vector<16x64xf32>
    %118 = arith.mulf %116, %117 : vector<16x64xf32>
    %cst_40 = arith.constant 4.471500e-02 : f32
    %119 = vector.broadcast %cst_40 : f32 to vector<16x64xf32>
    %120 = arith.mulf %119, %118 : vector<16x64xf32>
    %121 = arith.addf %116, %120 : vector<16x64xf32>
    %cst_41 = arith.constant 0.797884583 : f32
    %122 = vector.broadcast %cst_41 : f32 to vector<16x64xf32>
    %123 = arith.mulf %122, %121 : vector<16x64xf32>
    %124 = math.tanh %123 : vector<16x64xf32>
    %cst_42 = arith.constant 1.000000e+00 : f32
    %125 = vector.broadcast %cst_42 : f32 to vector<16x64xf32>
    %126 = arith.addf %125, %124 : vector<16x64xf32>
    %cst_43 = arith.constant 5.000000e-01 : f32
    %127 = vector.broadcast %cst_43 : f32 to vector<16x64xf32>
    %128 = arith.mulf %127, %126 : vector<16x64xf32>
    %129 = arith.mulf %116, %128 : vector<16x64xf32>
    %c0_44 = arith.constant 0 : index
    %c0_45 = arith.constant 0 : index
    %c0_46 = arith.constant 0 : index
    %130 = vector.load %arg5[%c0_44, %c0_45, %c0_46] : memref<2x64x32xf32, #tpu.memory_space<vmem>>, vector<1x64x32xf32>
    %131 = vector.shape_cast %130 : vector<1x64x32xf32> to vector<64x32xf32>
    %cst_47 = arith.constant dense<0.000000e+00> : vector<16x32xf32>
    %132 = tpu.matmul %129, %131, %cst_47 {dimension_numbers = #tpu.dot_dimension_numbers<[1], [0], [0], [1], [0, 0, 1, 1], [], []>} : vector<16x64xf32>, vector<64x32xf32>, vector<16x32xf32> -> vector<16x32xf32>
    %133 = vector.broadcast %46 : vector<1x32xf32> to vector<16x32xf32>
    %134 = arith.addf %132, %133 : vector<16x32xf32>
    %135 = arith.addf %111, %134 : vector<16x32xf32>
    %cst_48 = arith.constant dense<0.000000e+00> : vector<16xf32>
    %136 = vector.multi_reduction <add>, %135, %cst_48 [1] : vector<16x32xf32> to vector<16xf32>
    %137 = vector.shape_cast %136 : vector<16xf32> to vector<16x1xf32>
    %cst_49 = arith.constant 3.200000e+01 : f32
    %138 = vector.broadcast %cst_49 : f32 to vector<16x1xf32>
    %139 = arith.divf %137, %138 : vector<16x1xf32>
    %140 = vector.broadcast %139 : vector<16x1xf32> to vector<16x32xf32>
    %141 = arith.subf %135, %140 : vector<16x32xf32>
    %142 = arith.mulf %141, %141 : vector<16x32xf32>
    %cst_50 = arith.constant dense<0.000000e+00> : vector<16xf32>
    %143 = vector.multi_reduction <add>, %142, %cst_50 [1] : vector<16x32xf32> to vector<16xf32>
    %144 = vector.shape_cast %143 : vector<16xf32> to vector<16x1xf32>
    %cst_51 = arith.constant 3.200000e+01 : f32
    %145 = vector.broadcast %cst_51 : f32 to vector<16x1xf32>
    %146 = arith.divf %144, %145 : vector<16x1xf32>
    %147 = vector.broadcast %139 : vector<16x1xf32> to vector<16x32xf32>
    %148 = arith.subf %135, %147 : vector<16x32xf32>
    %cst_52 = arith.constant 9.99999996E-13 : f32
    %149 = vector.broadcast %cst_52 : f32 to vector<16x1xf32>
    %150 = arith.addf %146, %149 : vector<16x1xf32>
    %151 = math.rsqrt %150 : vector<16x1xf32>
    %152 = vector.broadcast %151 : vector<16x1xf32> to vector<16x32xf32>
    %153 = arith.mulf %148, %152 : vector<16x32xf32>
    %154 = vector.broadcast %47 : vector<1x32xf32> to vector<16x32xf32>
    %155 = arith.mulf %153, %154 : vector<16x32xf32>
    %156 = vector.broadcast %48 : vector<1x32xf32> to vector<16x32xf32>
    %157 = arith.addf %155, %156 : vector<16x32xf32>
    %c10 = arith.constant 10 : index
    %c0_53 = arith.constant 0 : index
    %158 = vector.load %arg1[%c10, %c0_53] : memref<88x128xf32, #tpu.memory_space<vmem>>, vector<1x96xf32>
    %c11 = arith.constant 11 : index
    %c0_54 = arith.constant 0 : index
    %159 = vector.load %arg1[%c11, %c0_54] : memref<88x128xf32, #tpu.memory_space<vmem>>, vector<1x32xf32>
    %c12 = arith.constant 12 : index
    %c0_55 = arith.constant 0 : index
    %160 = vector.load %arg1[%c12, %c0_55] : memref<88x128xf32, #tpu.memory_space<vmem>>, vector<1x32xf32>
    %c13 = arith.constant 13 : index
    %c0_56 = arith.constant 0 : index
    %161 = vector.load %arg1[%c13, %c0_56] : memref<88x128xf32, #tpu.memory_space<vmem>>, vector<1x32xf32>
    %c14 = arith.constant 14 : index
    %c0_57 = arith.constant 0 : index
    %162 = vector.load %arg1[%c14, %c0_57] : memref<88x128xf32, #tpu.memory_space<vmem>>, vector<1x64xf32>
    %c15 = arith.constant 15 : index
    %c0_58 = arith.constant 0 : index
    %163 = vector.load %arg1[%c15, %c0_58] : memref<88x128xf32, #tpu.memory_space<vmem>>, vector<1x32xf32>
    %c16 = arith.constant 16 : index
    %c0_59 = arith.constant 0 : index
    %164 = vector.load %arg1[%c16, %c0_59] : memref<88x128xf32, #tpu.memory_space<vmem>>, vector<1x32xf32>
    %c17 = arith.constant 17 : index
    %c0_60 = arith.constant 0 : index
    %165 = vector.load %arg1[%c17, %c0_60] : memref<88x128xf32, #tpu.memory_space<vmem>>, vector<1x32xf32>
    %c1_61 = arith.constant 1 : index
    %c0_62 = arith.constant 0 : index
    %c0_63 = arith.constant 0 : index
    %166 = vector.load %arg2[%c1_61, %c0_62, %c0_63] : memref<2x32x96xf32, #tpu.memory_space<vmem>>, vector<1x32x96xf32>
    %167 = vector.shape_cast %166 : vector<1x32x96xf32> to vector<32x96xf32>
    %cst_64 = arith.constant dense<0.000000e+00> : vector<16x96xf32>
    %168 = tpu.matmul %157, %167, %cst_64 {dimension_numbers = #tpu.dot_dimension_numbers<[1], [0], [0], [1], [0, 0, 1, 1], [], []>} : vector<16x32xf32>, vector<32x96xf32>, vector<16x96xf32> -> vector<16x96xf32>
    %169 = vector.broadcast %158 : vector<1x96xf32> to vector<16x96xf32>
    %170 = arith.addf %168, %169 : vector<16x96xf32>
    %171 = vector.extract_strided_slice %170 {offsets = [0, 0], sizes = [16, 32], strides = [1, 1]} : vector<16x96xf32> to vector<16x32xf32>
    %cst_65 = arith.constant 2.500000e-01 : f32
    %172 = vector.broadcast %cst_65 : f32 to vector<16x32xf32>
    %173 = arith.mulf %171, %172 : vector<16x32xf32>
    %174 = vector.extract_strided_slice %170 {offsets = [0, 32], sizes = [16, 32], strides = [1, 1]} : vector<16x96xf32> to vector<16x32xf32>
    %175 = vector.extract_strided_slice %170 {offsets = [0, 64], sizes = [16, 32], strides = [1, 1]} : vector<16x96xf32> to vector<16x32xf32>
    %176 = vector.broadcast %7 : vector<1x32xf32> to vector<16x32xf32>
    %177 = arith.mulf %173, %176 : vector<16x32xf32>
    %178 = vector.broadcast %14 : vector<1x32xf32> to vector<16x32xf32>
    %179 = arith.mulf %173, %178 : vector<16x32xf32>
    %180 = tpu.concatenate %177, %179 in 0 : vector<16x32xf32>, vector<16x32xf32> -> vector<32x32xf32>
    "tpu.trace_start"() <{level = 10 : i32, message = "qd,kd->qk"}> : () -> ()
    %cst_66 = arith.constant dense<0.000000e+00> : vector<32x16xf32>
    %181 = tpu.matmul %180, %174, %cst_66 {dimension_numbers = #tpu.dot_dimension_numbers<[1], [1], [0], [0], [0, 0, 1, 0], [], []>} : vector<32x32xf32>, vector<16x32xf32>, vector<32x16xf32> -> vector<32x16xf32>
    "tpu.trace_stop"() : () -> ()
    %182 = arith.addf %181, %15 : vector<32x16xf32>
    %cst_67 = arith.constant dense<0xFF800000> : vector<32xf32>
    %183 = vector.multi_reduction <maximumf>, %182, %cst_67 [1] : vector<32x16xf32> to vector<32xf32>
    %184 = vector.shape_cast %183 : vector<32xf32> to vector<32x1xf32>
    %185 = vector.broadcast %184 : vector<32x1xf32> to vector<32x16xf32>
    %186 = arith.subf %182, %185 : vector<32x16xf32>
    %187 = math.exp %186 : vector<32x16xf32>
    %cst_68 = arith.constant dense<0.000000e+00> : vector<32xf32>
    %188 = vector.multi_reduction <add>, %187, %cst_68 [1] : vector<32x16xf32> to vector<32xf32>
    %189 = vector.shape_cast %188 : vector<32xf32> to vector<32x1xf32>
    %190 = tpu.reciprocal %189 {approx = true} : vector<32x1xf32> -> vector<32x1xf32>
    %191 = vector.broadcast %190 : vector<32x1xf32> to vector<32x16xf32>
    %192 = arith.mulf %187, %191 : vector<32x16xf32>
    %cst_69 = arith.constant dense<0.000000e+00> : vector<32x32xf32>
    %193 = tpu.matmul %192, %175, %cst_69 {dimension_numbers = #tpu.dot_dimension_numbers<[1], [0], [0], [1], [0, 0, 1, 1], [], []>} : vector<32x16xf32>, vector<16x32xf32>, vector<32x32xf32> -> vector<32x32xf32>
    %194 = vector.extract_strided_slice %193 {offsets = [0, 0], sizes = [16, 32], strides = [1, 1]} : vector<32x32xf32> to vector<16x32xf32>
    %195 = vector.broadcast %7 : vector<1x32xf32> to vector<16x32xf32>
    %196 = arith.mulf %194, %195 : vector<16x32xf32>
    %197 = vector.extract_strided_slice %193 {offsets = [16, 0], sizes = [16, 32], strides = [1, 1]} : vector<32x32xf32> to vector<16x32xf32>
    %198 = vector.broadcast %14 : vector<1x32xf32> to vector<16x32xf32>
    %199 = arith.mulf %197, %198 : vector<16x32xf32>
    %200 = arith.addf %196, %199 : vector<16x32xf32>
    %c1_70 = arith.constant 1 : index
    %c0_71 = arith.constant 0 : index
    %c0_72 = arith.constant 0 : index
    %201 = vector.load %arg3[%c1_70, %c0_71, %c0_72] : memref<3x32x32xf32, #tpu.memory_space<vmem>>, vector<1x32x32xf32>
    %202 = vector.shape_cast %201 : vector<1x32x32xf32> to vector<32x32xf32>
    %cst_73 = arith.constant dense<0.000000e+00> : vector<16x32xf32>
    %203 = tpu.matmul %200, %202, %cst_73 {dimension_numbers = #tpu.dot_dimension_numbers<[1], [0], [0], [1], [0, 0, 1, 1], [], []>} : vector<16x32xf32>, vector<32x32xf32>, vector<16x32xf32> -> vector<16x32xf32>
    %204 = vector.broadcast %159 : vector<1x32xf32> to vector<16x32xf32>
    %205 = arith.addf %203, %204 : vector<16x32xf32>
    %206 = arith.addf %157, %205 : vector<16x32xf32>
    %cst_74 = arith.constant dense<0.000000e+00> : vector<16xf32>
    %207 = vector.multi_reduction <add>, %206, %cst_74 [1] : vector<16x32xf32> to vector<16xf32>
    %208 = vector.shape_cast %207 : vector<16xf32> to vector<16x1xf32>
    %cst_75 = arith.constant 3.200000e+01 : f32
    %209 = vector.broadcast %cst_75 : f32 to vector<16x1xf32>
    %210 = arith.divf %208, %209 : vector<16x1xf32>
    %211 = vector.broadcast %210 : vector<16x1xf32> to vector<16x32xf32>
    %212 = arith.subf %206, %211 : vector<16x32xf32>
    %213 = arith.mulf %212, %212 : vector<16x32xf32>
    %cst_76 = arith.constant dense<0.000000e+00> : vector<16xf32>
    %214 = vector.multi_reduction <add>, %213, %cst_76 [1] : vector<16x32xf32> to vector<16xf32>
    %215 = vector.shape_cast %214 : vector<16xf32> to vector<16x1xf32>
    %cst_77 = arith.constant 3.200000e+01 : f32
    %216 = vector.broadcast %cst_77 : f32 to vector<16x1xf32>
    %217 = arith.divf %215, %216 : vector<16x1xf32>
    %218 = vector.broadcast %210 : vector<16x1xf32> to vector<16x32xf32>
    %219 = arith.subf %206, %218 : vector<16x32xf32>
    %cst_78 = arith.constant 9.99999996E-13 : f32
    %220 = vector.broadcast %cst_78 : f32 to vector<16x1xf32>
    %221 = arith.addf %217, %220 : vector<16x1xf32>
    %222 = math.rsqrt %221 : vector<16x1xf32>
    %223 = vector.broadcast %222 : vector<16x1xf32> to vector<16x32xf32>
    %224 = arith.mulf %219, %223 : vector<16x32xf32>
    %225 = vector.broadcast %160 : vector<1x32xf32> to vector<16x32xf32>
    %226 = arith.mulf %224, %225 : vector<16x32xf32>
    %227 = vector.broadcast %161 : vector<1x32xf32> to vector<16x32xf32>
    %228 = arith.addf %226, %227 : vector<16x32xf32>
    %c1_79 = arith.constant 1 : index
    %c0_80 = arith.constant 0 : index
    %c0_81 = arith.constant 0 : index
    %229 = vector.load %arg4[%c1_79, %c0_80, %c0_81] : memref<2x32x64xf32, #tpu.memory_space<vmem>>, vector<1x32x64xf32>
    %230 = vector.shape_cast %229 : vector<1x32x64xf32> to vector<32x64xf32>
    %cst_82 = arith.constant dense<0.000000e+00> : vector<16x64xf32>
    %231 = tpu.matmul %228, %230, %cst_82 {dimension_numbers = #tpu.dot_dimension_numbers<[1], [0], [0], [1], [0, 0, 1, 1], [], []>} : vector<16x32xf32>, vector<32x64xf32>, vector<16x64xf32> -> vector<16x64xf32>
    %232 = vector.broadcast %162 : vector<1x64xf32> to vector<16x64xf32>
    %233 = arith.addf %231, %232 : vector<16x64xf32>
    %234 = arith.mulf %233, %233 : vector<16x64xf32>
    %235 = arith.mulf %233, %234 : vector<16x64xf32>
    %cst_83 = arith.constant 4.471500e-02 : f32
    %236 = vector.broadcast %cst_83 : f32 to vector<16x64xf32>
    %237 = arith.mulf %236, %235 : vector<16x64xf32>
    %238 = arith.addf %233, %237 : vector<16x64xf32>
    %cst_84 = arith.constant 0.797884583 : f32
    %239 = vector.broadcast %cst_84 : f32 to vector<16x64xf32>
    %240 = arith.mulf %239, %238 : vector<16x64xf32>
    %241 = math.tanh %240 : vector<16x64xf32>
    %cst_85 = arith.constant 1.000000e+00 : f32
    %242 = vector.broadcast %cst_85 : f32 to vector<16x64xf32>
    %243 = arith.addf %242, %241 : vector<16x64xf32>
    %cst_86 = arith.constant 5.000000e-01 : f32
    %244 = vector.broadcast %cst_86 : f32 to vector<16x64xf32>
    %245 = arith.mulf %244, %243 : vector<16x64xf32>
    %246 = arith.mulf %233, %245 : vector<16x64xf32>
    %c1_87 = arith.constant 1 : index
    %c0_88 = arith.constant 0 : index
    %c0_89 = arith.constant 0 : index
    %247 = vector.load %arg5[%c1_87, %c0_88, %c0_89] : memref<2x64x32xf32, #tpu.memory_space<vmem>>, vector<1x64x32xf32>
    %248 = vector.shape_cast %247 : vector<1x64x32xf32> to vector<64x32xf32>
    %cst_90 = arith.constant dense<0.000000e+00> : vector<16x32xf32>
    %249 = tpu.matmul %246, %248, %cst_90 {dimension_numbers = #tpu.dot_dimension_numbers<[1], [0], [0], [1], [0, 0, 1, 1], [], []>} : vector<16x64xf32>, vector<64x32xf32>, vector<16x32xf32> -> vector<16x32xf32>
    %250 = vector.broadcast %163 : vector<1x32xf32> to vector<16x32xf32>
    %251 = arith.addf %249, %250 : vector<16x32xf32>
    %252 = arith.addf %228, %251 : vector<16x32xf32>
    %cst_91 = arith.constant dense<0.000000e+00> : vector<16xf32>
    %253 = vector.multi_reduction <add>, %252, %cst_91 [1] : vector<16x32xf32> to vector<16xf32>
    %254 = vector.shape_cast %253 : vector<16xf32> to vector<16x1xf32>
    %cst_92 = arith.constant 3.200000e+01 : f32
    %255 = vector.broadcast %cst_92 : f32 to vector<16x1xf32>
    %256 = arith.divf %254, %255 : vector<16x1xf32>
    %257 = vector.broadcast %256 : vector<16x1xf32> to vector<16x32xf32>
    %258 = arith.subf %252, %257 : vector<16x32xf32>
    %259 = arith.mulf %258, %258 : vector<16x32xf32>
    %cst_93 = arith.constant dense<0.000000e+00> : vector<16xf32>
    %260 = vector.multi_reduction <add>, %259, %cst_93 [1] : vector<16x32xf32> to vector<16xf32>
    %261 = vector.shape_cast %260 : vector<16xf32> to vector<16x1xf32>
    %cst_94 = arith.constant 3.200000e+01 : f32
    %262 = vector.broadcast %cst_94 : f32 to vector<16x1xf32>
    %263 = arith.divf %261, %262 : vector<16x1xf32>
    %264 = vector.broadcast %256 : vector<16x1xf32> to vector<16x32xf32>
    %265 = arith.subf %252, %264 : vector<16x32xf32>
    %cst_95 = arith.constant 9.99999996E-13 : f32
    %266 = vector.broadcast %cst_95 : f32 to vector<16x1xf32>
    %267 = arith.addf %263, %266 : vector<16x1xf32>
    %268 = math.rsqrt %267 : vector<16x1xf32>
    %269 = vector.broadcast %268 : vector<16x1xf32> to vector<16x32xf32>
    %270 = arith.mulf %265, %269 : vector<16x32xf32>
    %271 = vector.broadcast %164 : vector<1x32xf32> to vector<16x32xf32>
    %272 = arith.mulf %270, %271 : vector<16x32xf32>
    %273 = vector.broadcast %165 : vector<1x32xf32> to vector<16x32xf32>
    %274 = arith.addf %272, %273 : vector<16x32xf32>
    %275 = tpu.iota {dimensions = array<i32: 1>} : vector<2x16xi32>
    %276 = tpu.iota {dimensions = array<i32: 0>} : vector<2x16xi32>
    %c8_i32 = arith.constant 8 : i32
    %277 = vector.broadcast %c8_i32 : i32 to vector<2x16xi32>
    %278 = arith.muli %276, %277 : vector<2x16xi32>
    %279 = arith.cmpi eq, %275, %278 : vector<2x16xi32>
    %280 = arith.extui %279 : vector<2x16xi1> to vector<2x16xi32>
    %281 = arith.sitofp %280 : vector<2x16xi32> to vector<2x16xf32>
    %cst_96 = arith.constant dense<0.000000e+00> : vector<2x32xf32>
    %282 = tpu.matmul %281, %274, %cst_96 {dimension_numbers = #tpu.dot_dimension_numbers<[1], [0], [0], [1], [0, 0, 1, 1], [], []>} : vector<2x16xf32>, vector<16x32xf32>, vector<2x32xf32> -> vector<2x32xf32>
    %c18 = arith.constant 18 : index
    %c0_97 = arith.constant 0 : index
    %283 = vector.load %arg1[%c18, %c0_97] : memref<88x128xf32, #tpu.memory_space<vmem>>, vector<1x32xf32>
    %c2_98 = arith.constant 2 : index
    %c0_99 = arith.constant 0 : index
    %c0_100 = arith.constant 0 : index
    %284 = vector.load %arg3[%c2_98, %c0_99, %c0_100] : memref<3x32x32xf32, #tpu.memory_space<vmem>>, vector<1x32x32xf32>
    %285 = vector.shape_cast %284 : vector<1x32x32xf32> to vector<32x32xf32>
    %cst_101 = arith.constant dense<0.000000e+00> : vector<2x32xf32>
    %286 = tpu.matmul %282, %285, %cst_101 {dimension_numbers = #tpu.dot_dimension_numbers<[1], [0], [0], [1], [0, 0, 1, 1], [], []>} : vector<2x32xf32>, vector<32x32xf32>, vector<2x32xf32> -> vector<2x32xf32>
    %287 = vector.broadcast %283 : vector<1x32xf32> to vector<2x32xf32>
    %288 = arith.addf %286, %287 : vector<2x32xf32>
    %289 = math.tanh %288 : vector<2x32xf32>
    %c56 = arith.constant 56 : index
    %c0_102 = arith.constant 0 : index
    %290 = vector.load %arg1[%c56, %c0_102] : memref<88x128xf32, #tpu.memory_space<vmem>>, vector<32x128xf32>
    %c19 = arith.constant 19 : index
    %c0_103 = arith.constant 0 : index
    %291 = vector.load %arg1[%c19, %c0_103] : memref<88x128xf32, #tpu.memory_space<vmem>>, vector<1x128xf32>
    %cst_104 = arith.constant dense<0.000000e+00> : vector<2x128xf32>
    %292 = tpu.matmul %289, %290, %cst_104 {dimension_numbers = #tpu.dot_dimension_numbers<[1], [0], [0], [1], [0, 0, 1, 1], [], []>} : vector<2x32xf32>, vector<32x128xf32>, vector<2x128xf32> -> vector<2x128xf32>
    %293 = vector.broadcast %291 : vector<1x128xf32> to vector<2x128xf32>
    %294 = arith.addf %292, %293 : vector<2x128xf32>
    %c0_105 = arith.constant 0 : index
    %c0_106 = arith.constant 0 : index
    %295 = vector.load %arg7[%c0_105, %c0_106] : memref<2x128xf32, #tpu.memory_space<vmem>>, vector<2x128xf32>
    tpu.vector_store %arg7[%c0_105, %c0_106], %294 {strides = array<i32>} : memref<2x128xf32, #tpu.memory_space<vmem>>, vector<2x128xf32>,
    %296 = tpu.iota {dimensions = array<i32: 1>} : vector<2x128xi32>
    %297 = tpu.iota {dimensions = array<i32: 0>} : vector<2x128xi32>
    %c3_i32 = arith.constant 3 : i32
    %298 = vector.broadcast %c3_i32 : i32 to vector<2x128xi32>
    %299 = arith.cmpi slt, %296, %298 : vector<2x128xi32>
    %cst_107 = arith.constant -1.000000e+30 : f32
    %300 = vector.broadcast %cst_107 : f32 to vector<2x128xf32>
    %301 = arith.select %299, %294, %300 : vector<2x128xi1>, vector<2x128xf32>
    %cst_108 = arith.constant dense<0xFF800000> : vector<2xf32>
    %302 = vector.multi_reduction <maximumf>, %301, %cst_108 [1] : vector<2x128xf32> to vector<2xf32>
    %303 = vector.shape_cast %302 : vector<2xf32> to vector<2x1xf32>
    %304 = vector.broadcast %303 : vector<2x1xf32> to vector<2x128xf32>
    %305 = arith.subf %301, %304 : vector<2x128xf32>
    %306 = math.exp %305 : vector<2x128xf32>
    %cst_109 = arith.constant dense<0.000000e+00> : vector<2xf32>
    %307 = vector.multi_reduction <add>, %306, %cst_109 [1] : vector<2x128xf32> to vector<2xf32>
    %308 = vector.shape_cast %307 : vector<2xf32> to vector<2x1xf32>
    %309 = math.log %308 : vector<2x1xf32>
    %310 = arith.addf %303, %309 : vector<2x1xf32>
    %c0_i32_110 = arith.constant 0 : i32
    %311 = vector.broadcast %c0_i32_110 : i32 to vector<2x128xi32>
    %c0_i32_111 = arith.constant 0 : i32
    %312 = vector.broadcast %c0_i32_111 : i32 to vector<2x128xi32>
    %313 = arith.cmpi eq, %297, %312 : vector<2x128xi32>
    %c0_112 = arith.constant 0 : index
    %314 = memref.load %arg6[%c0_112] : memref<2xi32, #tpu.memory_space<smem>>
    %315 = vector.broadcast %314 : i32 to vector<2x128xi32>
    %316 = arith.select %313, %315, %311 : vector<2x128xi1>, vector<2x128xi32>
    %c1_i32 = arith.constant 1 : i32
    %317 = vector.broadcast %c1_i32 : i32 to vector<2x128xi32>
    %318 = arith.cmpi eq, %297, %317 : vector<2x128xi32>
    %c1_113 = arith.constant 1 : index
    %319 = memref.load %arg6[%c1_113] : memref<2xi32, #tpu.memory_space<smem>>
    %320 = vector.broadcast %319 : i32 to vector<2x128xi32>
    %321 = arith.select %318, %320, %316 : vector<2x128xi1>, vector<2x128xi32>
    %322 = arith.cmpi eq, %296, %321 : vector<2x128xi32>
    %323 = arith.extui %322 : vector<2x128xi1> to vector<2x128xi32>
    %324 = arith.sitofp %323 : vector<2x128xi32> to vector<2x128xf32>
    %325 = arith.mulf %324, %294 : vector<2x128xf32>
    %cst_114 = arith.constant dense<0.000000e+00> : vector<2xf32>
    %326 = vector.multi_reduction <add>, %325, %cst_114 [1] : vector<2x128xf32> to vector<2xf32>
    %327 = vector.shape_cast %326 : vector<2xf32> to vector<2x1xf32>
    %328 = arith.subf %310, %327 : vector<2x1xf32>
    %cst_115 = arith.constant dense<0.000000e+00> : vector<1xf32>
    %329 = vector.multi_reduction <add>, %328, %cst_115 [0] : vector<2x1xf32> to vector<1xf32>
    %330 = vector.shape_cast %329 : vector<1xf32> to vector<1x1xf32>
    %cst_116 = arith.constant 5.000000e-01 : f32
    %331 = vector.broadcast %cst_116 : f32 to vector<1x1xf32>
    %332 = arith.mulf %330, %331 : vector<1x1xf32>
    %c0_117 = arith.constant 0 : index
    %c0_118 = arith.constant 0 : index
    %333 = vector.load %arg8[%c0_117, %c0_118] : memref<1x1xf32, #tpu.memory_space<vmem>>, vector<1x1xf32>
    tpu.vector_store %arg8[%c0_117, %c0_118], %332 {strides = array<i32>} : memref<1x1xf32, #tpu.memory_space<vmem>>, vector<1x1xf32>,
    return
  }
}

</mosaic_0001>

<bundles_post_ra>
// kernel: quant_bert_forward.1
= control target key start
LH: loop header
LB: loop body
LE: loop exit
PB: predicated region body
PF: predicated region fallthrough
CT: control target
= control target key end

     0   :  { %14 = vsyncpa [#allocation4], 0  ;;  %s2854_s0 = inlined_call_operand.vmem [shape: f32[16,32], index: 0, kind: input, shape index: {}]   ;;  %s2855_s1 = inlined_call_operand.vmem [shape: f32[88,128], index: 1, kind: input, shape index: {}]   ;;  %s2856_s2 = inlined_call_operand.vmem [shape: f32[2,32,96], index: 2, kind: input, shape index: {}]   ;;  %s2857_s3 = inlined_call_operand.vmem [shape: f32[3,32,32], index: 3, kind: input, shape index: {}]   ;;  %s2858_s4 = inlined_call_operand.vmem [shape: f32[2,32,64], index: 4, kind: input, shape index: {}]   ;;  %s2859_s5 = inlined_call_operand.vmem [shape: f32[2,64,32], index: 5, kind: input, shape index: {}]   ;;  %s2860_s6 = inlined_call_operand.vmem [shape: s32[2], index: 6, kind: input, shape index: {}]   ;;  %s2861_s7 = inlined_call_operand.hbm [shape: f32[2,128], index: 7, kind: output, shape index: {0}]   ;;  %s2862_s8 = inlined_call_operand.hbm [shape: f32[1,1], index: 8, kind: output, shape index: {1}]  }
   0x1   :  { %15 = vsyncpa [#allocation3], 0 }
   0x2   :  { %16 = vsyncpa [#allocation7], 0  ;;  %s35_s29 = sshll.u32 %s2860_s6, 4  ;;  %s36_s29 = int_to_ptr.vmem [resolvable:$true] %s35_s29 }
   0x3   :  { %s2316_s30 = scalar_lea.vmem %s36_s29, 16  ;;  %p2321_p1 = scmp.lt.s32.totalorder %s36_s29, %s36_s29 }
   0x4   :  { %p2317_p0 = scmp.ne.s32.totalorder %s36_s29, %s2316_s30  ;;  %p2322_p2 = scmp.lt.s32.totalorder %s2316_s30, %s2316_s30 }
   0x6   :  { %p2323_p3 = por %p2322_p2, %p2321_p1 }
   0x8   :  { %p2324_p4 = pnand %p2323_p3, %p2317_p0 }
   0xa   :  { %2327 = shalt.err (!%p2324_p4)
}
   0xb   :  { %s2374_s9 = smov [#allocation2]  }
   0xc   :  { %38 = dma.vmem_to_smem %s36_s29, 16, %s2374_s9, [#allocation4]  }
   0xd   :  { %2368 = dma.done.wait [#allocation4], 16  }
   0xe   :  { %2369 = vsyncadd [#allocation4], 4294967280 }
   0xf   :  { %42 = sfence }
  0x10   :  { %v59_v0 = vld [vmem:[%s2854_s0] sm:$0xff]  ;;  %vm63_vm0 = vcmask 261120   ;;  %v60_v1 = vld [vmem:[%s2854_s0 + $0x8] sm:$0xff]  ;;  %v114_v14 = vld [vmem:[%s2856_s2 + $0x18] sm:$0xff]  ;;  %v43_v34 = vlaneseq  ;;  %s2375_s26 = smov 96   ;;  %v2376_v42 = vmov 0.0  }
  0x11   :  { %v64_v2 = vsel %vm63_vm0, %v59_v0, 0.0  ;;  %v67_v3 = vsel %vm63_vm0, %v60_v1, 0.0  ;;  %v113_v15 = vld [vmem:[%s2856_s2 + $0x10] sm:$0xff]  ;;  %2070 = vmatprep.subr.mxu0 %v114_v14  ;;  %v112_v16 = vld [vmem:[%s2856_s2 + $0x8] sm:$0xff]  ;;  %v111_v17 = vld [vmem:[%s2856_s2] sm:$0xff]  ;;  %vm313_vm5 = vcmask 130048  }
  0x12   :  { %65 = vadd.xlane.f32.xlu0 %v64_v2  ;;  %2071 = vmatpush3.msra.mxu0 %v114_v14  ;;  %v1891_v25 = vld [vmem:[%s2855_s1] ss:$0 sm:$0xff]  ;;  %v1892_v27 = vld [vmem:[%s2855_s1 + $0x1] ss:$0 sm:$0xff]  ;;  %v1893_v35 = vld [vmem:[%s2855_s1 + $0x2] ss:$0 sm:$0xff] }
  0x13   :  { %2072 = vmatprep.subr.mxu0 %v113_v15  ;;  %v2469_v36 = vand.u32 127, %v43_v34  ;;  %v2505_v52 = vld [vmem:[%s2855_s1 + $0x20] sm:$0xff]  ;;  %v2510_v54 = vld [vmem:[%s2855_s1 + $0x18] sm:$0xff]  ;;  %v2516_v57 = vld [vmem:[%s2855_s1 + $0x30] sm:$0xff]  ;;  %s2377_s6 = smov 64   ;;  %vm715_vm6 = vcmask 523264  }
  0x14   :  { %2073 = vmatpush3.msra.mxu0 %v113_v15  ;;  %v2523_v61 = vld [vmem:[%s2855_s1 + $0x28] sm:$0xff]  ;;  %vm2378_vm7 = vmmov 0   ;;  %s1835_s10 = sld [smem:[#allocation2]]  ;;  %vm1821_vm13 = vcmask 1041408  }
  0x15   :  { %2074 = vmatprep.subr.mxu0 %v112_v16  ;;  %vm46_vm1 = vcmp.lt.s32.totalorder %v2469_v36, 16  ;;  %vm50_vm2 = vcmp.ge.s32.totalorder %v2469_v36, 16  ;;  %vm51_vm3 = vcmp.lt.s32.totalorder %v2469_v36, 32  ;;  %s1975_s11 = sld [smem:[#allocation2 + $0x1]]  ;;  %vm1819_vm12 = vcmp.lt.s32.totalorder %v2469_v36, 3 }
  0x16   :  { %68 = vadd.xlane.f32.xlu0 %v67_v3  ;;  %2075 = vmatpush3.msra.mxu0 %v112_v16  ;;  %v2482_v43 = vsel %vm46_vm1, 1.0, %v2376_v42  ;;  %vm52_vm4 = vmand %vm50_vm2, %vm51_vm3 }
  0x17   :  { %2076 = vmatprep.subr.mxu0 %v111_v17  ;;  %v2494_v48 = vsel %vm52_vm4, 1.0, %v2376_v42 }
  0x18   :  { %2077 = vmatpush3.msra.mxu0 %v111_v17 }
  0x9b   :  { %v66_v4 = vpop.xlane.xlu0 %65 }
  0x9c   :  { %v71_v5 = vmul.f32 0.03125, %v66_v4 }
  0x9e   :  { %v73_v6 = vsub.f32 %v59_v0, %v71_v5 }
  0x9f   :  { %v69_v7 = vpop.xlane.xlu0 %68 }
  0xa0   :  { %v72_v8 = vmul.f32 0.03125, %v69_v7  ;;  %v75_v9 = vmul.f32 %v73_v6, %v73_v6 }
  0xa2   :  { %v74_v10 = vsub.f32 %v60_v1, %v72_v8  ;;  %v77_v11 = vsel %vm63_vm0, %v75_v9, 0.0 }
  0xa3   :  { %78 = vadd.xlane.f32.xlu1 %v77_v11 }
  0xa4   :  { %v76_v12 = vmul.f32 %v74_v10, %v74_v10 }
  0xa6   :  { %v80_v13 = vsel %vm63_vm0, %v76_v12, 0.0 }
  0xa7   :  { %81 = vadd.xlane.f32.xlu1 %v80_v13 }
 0x12c   :  { %v79_v18 = vpop.xlane.xlu1 %78 }
 0x12d   :  { %v83_v19 = vmul.f32 0.03125, %v79_v18 }
 0x12f   :  { %v85_v20 = vadd.f32 1e-12, %v83_v19 }
 0x130   :  { %v82_v21 = vpop.xlane.xlu1 %81 }
 0x131   :  { %2250 = vrsqrt.f32 %v85_v20  ;;  %v84_v22 = vmul.f32 0.03125, %v82_v21 }
 0x133   :  { %v86_v23 = vadd.f32 1e-12, %v84_v22 }
 0x135   :  { %2252 = vrsqrt.f32 %v86_v23 }
 0x13e   :  { %v2251_v24 = vpop.eup %2250 }
 0x13f   :  { %v89_v26 = vmul.f32 %v2251_v24, %v73_v6 }
 0x141   :  { %v95_v28 = vmul.f32 %v1891_v25, %v89_v26 }
 0x142   :  { %v2253_v29 = vpop.eup %2252 }
 0x143   :  { %v90_v30 = vmul.f32 %v2253_v29, %v74_v10  ;;  %v2457_v31 = vadd.f32 %v1892_v27, %v95_v28 }
 0x145   :  { %v96_v32 = vmul.f32 %v1891_v25, %v90_v30  ;;  %2078 = vmatprep.mubr.msk.f32.mxu0 %vm63_vm0, %v2457_v31 }
 0x147   :  { %v2461_v33 = vadd.f32 %v1892_v27, %v96_v32 }
 0x149   :  { %2079 = vmatmul.mubr.msk.f32.vlgmr.msra.gmra.mxu0 %vm63_vm0, %v2461_v33 }
 0x209   :  { %v2080_v37 = vpop.f32.mrf.mxu0 }
 0x20a   :  { %v2471_v38 = vadd.f32 %v2080_v37, %v1893_v35 }
 0x20b   :  { %v191_v39 = vpop.f32.mrf.mxu0 }
 0x20c   :  { %v2474_v40 = vadd.f32 %v1893_v35, %v191_v39  ;;  %210 = vrot.lane.b32.xlu0 %v2471_v38, %s2375_s26  ;;  %v201_v47 = vmul.f32 0.25, %v2471_v38 }
 0x20e   :  { %208 = vrot.lane.b32.xlu1 %v2474_v40, %s2375_s26  ;;  %v200_v41 = vmul.f32 0.25, %v2474_v40  ;;  %v203_v49 = vmul.f32 %v2482_v43, %v201_v47  ;;  %v205_v51 = vmul.f32 %v2494_v48, %v201_v47  ;;  %v467_v47 = vld [vmem:[%s2857_s3] sm:$0xff] }
 0x210   :  { %v202_v44 = vmul.f32 %v2482_v43, %v200_v41  ;;  %v204_v50 = vmul.f32 %v2494_v48, %v200_v41 }
 0x212   :  { %2085 = vmatprep.mubr.msk.f32.mxu1 %vm63_vm0, %v202_v44  ;;  %v470_v44 = vld [vmem:[%s2857_s3 + $0x18] sm:$0xff] }
 0x27e   :  { %v211_v45 = vpop.permute.xlu0 %210 }
 0x27f   :  { %2081 = vmatprep.subr.msk.mxu1 %vm63_vm0, %v211_v45 }
 0x280   :  { %2082 = vmatpush3.xpose.msk.msra.mxu1 %vm63_vm0, %v211_v45  ;;  %v209_v46 = vpop.permute.xlu1 %208  ;;  %v469_v45 = vld [vmem:[%s2857_s3 + $0x10] sm:$0xff] }
 0x281   :  { %2083 = vmatprep.subr.msk.mxu1 %vm63_vm0, %v209_v46 }
 0x284   :  { %2084 = vmatpush3.xpose.msk.msra.mxu1 %vm63_vm0, %v209_v46  ;;  %v468_v46 = vld [vmem:[%s2857_s3 + $0x8] sm:$0xff] }
 0x285   :  { %2101 = vmatprep.subr.mxu1 %v470_v44 }
 0x287   :  { %2086 = vmatmul.mubr.msk.f32.vlgmr.msra.gmra.mxu1 %vm63_vm0, %v203_v49 }
 0x288   :  { %2088 = vmatprep.mubr.msk.f32.mxu1 %vm63_vm0, %v204_v50  ;;  %2102 = vmatpush3.msra.mxu1 %v470_v44  ;;  %v708_v44 = vld [vmem:[%s2859_s5 + $0x28] sm:$0xff] }
 0x289   :  { %2103 = vmatprep.subr.mxu1 %v469_v45 }
 0x28a   :  { %2104 = vmatpush3.msra.mxu1 %v469_v45  ;;  %v707_v45 = vld [vmem:[%s2859_s5 + $0x20] sm:$0xff] }
 0x28b   :  { %2089 = vmatmul.mubr.msk.f32.gmra.mxu1 %vm63_vm0, %v205_v51  ;;  %2105 = vmatprep.subr.mxu1 %v468_v46 }
 0x28c   :  { %2106 = vmatpush3.msra.mxu1 %v468_v46  ;;  %v706_v46 = vld [vmem:[%s2859_s5 + $0x18] sm:$0xff] }
 0x28d   :  { %2107 = vmatprep.subr.mxu1 %v467_v47 }
 0x28e   :  { %2108 = vmatpush3.msra.mxu1 %v467_v47  ;;  %v705_v47 = vld [vmem:[%s2859_s5 + $0x10] sm:$0xff] }
 0x347   :  { %v2087_v53 = vpop.f32.mrf.mxu1 }
 0x348   :  { %v300_v55 = vadd.f32 %v2087_v53, %v2505_v52 }
 0x349   :  { %v294_v56 = vpop.f32.mrf.mxu1 }
 0x34a   :  { %v295_v58 = vadd.f32 %v294_v56, %v2510_v54  ;;  %v317_v59 = vsel %vm313_vm5, %v300_v55, -inf }
 0x34b   :  { %318 = vmax.xlane.f32.xlu0 %v317_v59  ;;  %v2090_v60 = vpop.f32.mrf.mxu1 }
 0x34c   :  { %v310_v62 = vadd.f32 %v2090_v60, %v2516_v57  ;;  %v314_v63 = vsel %vm313_vm5, %v295_v58, -inf }
 0x34d   :  { %v304_v0 = vpop.f32.mrf.mxu1  ;;  %315 = vmax.xlane.f32.xlu1 %v314_v63  ;;  %v1906_v63 = vld [vmem:[%s2855_s1 + $0x3] ss:$0 sm:$0xff] }
 0x34e   :  { %v305_v1 = vadd.f32 %v304_v0, %v2523_v61  ;;  %v323_v3 = vsel %vm313_vm5, %v310_v62, -inf }
 0x350   :  { %v320_v2 = vsel %vm313_vm5, %v305_v1, -inf }
 0x351   :  { %321 = vmax.xlane.f32.xlu0 %v320_v2  ;;  %324 = vmax.xlane.f32.xlu1 %v323_v3 }
 0x3d4   :  { %v319_v4 = vpop.xlane.xlu0 %318 }
 0x3d5   :  { %v327_v5 = vsub.f32 %v300_v55, %v319_v4 }
 0x3d6   :  { %v316_v6 = vpop.xlane.xlu1 %315 }
 0x3d7   :  { %v332_v7 = vmul.f32 1.442695, %v327_v5  ;;  %v326_v8 = vsub.f32 %v295_v58, %v316_v6 }
 0x3d9   :  { %2254 = vpow2.f32 %v332_v7  ;;  %v330_v9 = vmul.f32 1.442695, %v326_v8 }
 0x3da   :  { %v322_v10 = vpop.xlane.xlu0 %321  ;;  %v325_v11 = vpop.xlane.xlu1 %324 }
 0x3db   :  { %2256 = vpow2.f32 %v330_v9  ;;  %v328_v12 = vsub.f32 %v305_v1, %v322_v10  ;;  %v329_v13 = vsub.f32 %v310_v62, %v325_v11 }
 0x3dd   :  { %v334_v14 = vmul.f32 1.442695, %v328_v12  ;;  %v336_v15 = vmul.f32 1.442695, %v329_v13 }
 0x3df   :  { %2258 = vpow2.f32 %v334_v14 }
 0x3e0   :  { %2260 = vpow2.f32 %v336_v15 }
 0x3e6   :  { %v2255_v16 = vpop.eup %2254 }
 0x3e7   :  { %v341_v17 = vsel %vm313_vm5, %v2255_v16, 0.0 }
 0x3e8   :  { %v2257_v18 = vpop.eup %2256  ;;  %342 = vadd.xlane.f32.xlu1 %v341_v17  ;;  %v598_v17 = vld [vmem:[%s2858_s4 + $0x10] sm:$0xff] }
 0x3e9   :  { %v338_v19 = vsel %vm313_vm5, %v2257_v18, 0.0 }
 0x3ea   :  { %339 = vadd.xlane.f32.xlu0 %v338_v19  ;;  %v596_v19 = vld [vmem:[%s2858_s4] sm:$0xff] }
 0x3ec   :  { %v2259_v20 = vpop.eup %2258 }
 0x3ed   :  { %v2261_v21 = vpop.eup %2260  ;;  %v344_v22 = vsel %vm313_vm5, %v2259_v20, 0.0 }
 0x3ee   :  { %345 = vadd.xlane.f32.xlu0 %v344_v22  ;;  %v347_v23 = vsel %vm313_vm5, %v2261_v21, 0.0 }
 0x3ef   :  { %348 = vadd.xlane.f32.xlu1 %v347_v23 }
 0x400   :  { %358 = vrot.lane.b32.xlu1 %v2474_v40, %s2377_s6 }
 0x404   :  { %360 = vrot.lane.b32.xlu0 %v2471_v38, %s2377_s6 }
 0x471   :  { %v343_v24 = vpop.xlane.xlu1 %342 }
 0x472   :  { %2262 = vrcp.f32 %v343_v24 }
 0x473   :  { %v340_v25 = vpop.xlane.xlu0 %339 }
 0x474   :  { %2264 = vrcp.f32 %v340_v25 }
 0x477   :  { %v346_v26 = vpop.xlane.xlu0 %345 }
 0x478   :  { %2266 = vrcp.f32 %v346_v26  ;;  %v349_v27 = vpop.xlane.xlu1 %348 }
 0x479   :  { %2268 = vrcp.f32 %v349_v27  ;;  %v1909_v27 = vld [vmem:[%s2855_s1 + $0x4] ss:$0 sm:$0xff] }
 0x47b   :  { %v361_v28 = vpop.permute.xlu0 %360 }
 0x47c   :  { %2091 = vmatprep.subr.mxu0 %v361_v28  ;;  %v359_v29 = vpop.permute.xlu1 %358 }
 0x47d   :  { %2092 = vmatpush3.msra.mxu0 %v361_v28 }
 0x47e   :  { %2093 = vmatprep.subr.mxu0 %v359_v29 }
 0x47f   :  { %2094 = vmatpush3.msra.mxu0 %v359_v29  ;;  %v2263_v30 = vpop.eup %2262 }
 0x480   :  { %v355_v37 = vmul.f32 %v2263_v30, %v2255_v16 }
 0x481   :  { %v2265_v32 = vpop.eup %2264 }
 0x482   :  { %v354_v35 = vmul.f32 %v2265_v32, %v2257_v18  ;;  %v597_v18 = vld [vmem:[%s2858_s4 + $0x8] sm:$0xff] }
 0x484   :  { %2095 = vmatprep.mubr.msk.f32.mxu0 %vm313_vm5, %v354_v35  ;;  %v1910_v35 = vld [vmem:[%s2855_s1 + $0x5] ss:$0 sm:$0xff] }
 0x485   :  { %v2267_v38 = vpop.eup %2266  ;;  %2096 = vmatmul.mubr.msk.f32.vlgmr.msra.gmra.mxu0 %vm313_vm5, %v355_v37 }
 0x486   :  { %v2269_v39 = vpop.eup %2268  ;;  %v356_v40 = vmul.f32 %v2267_v38, %v2259_v20 }
 0x487   :  { %v357_v41 = vmul.f32 %v2269_v39, %v2261_v21 }
 0x488   :  { %2098 = vmatprep.mubr.msk.f32.mxu0 %vm313_vm5, %v356_v40  ;;  %v710_v40 = vld [vmem:[%s2859_s5 + $0x38] sm:$0xff] }
 0x489   :  { %2099 = vmatmul.mubr.msk.f32.gmra.mxu0 %vm313_vm5, %v357_v41  ;;  %2123 = vmatprep.subr.mxu1 %v710_v40  ;;  %v709_v41 = vld [vmem:[%s2859_s5 + $0x30] sm:$0xff] }
 0x545   :  { %v2097_v49 = vpop.f32.mrf.mxu0 }
 0x546   :  { %v462_v59 = vmul.f32 %v2097_v49, %v2482_v43  ;;  %v704_v49 = vld [vmem:[%s2859_s5 + $0x8] sm:$0xff] }
 0x547   :  { %v442_v50 = vpop.f32.mrf.mxu0 }
 0x548   :  { %v461_v56 = vmul.f32 %v2482_v43, %v442_v50  ;;  %v703_v50 = vld [vmem:[%s2859_s5] sm:$0xff] }
 0x549   :  { %v2100_v51 = vpop.f32.mrf.mxu0 }
 0x54a   :  { %v464_v53 = vmul.f32 %v2100_v51, %v2494_v48  ;;  %v1911_v51 = vld [vmem:[%s2855_s1 + $0x6] ss:$0 sm:$0xff] }
 0x54b   :  { %v452_v55 = vpop.f32.mrf.mxu0 }
 0x54c   :  { %v463_v58 = vmul.f32 %v2494_v48, %v452_v55  ;;  %v466_v62 = vadd.f32 %v464_v53, %v462_v59 }
 0x54e   :  { %v465_v60 = vadd.f32 %v463_v58, %v461_v56 }
 0x550   :  { %2109 = vmatprep.mubr.msk.f32.mxu1 %vm63_vm0, %v465_v60 }
 0x551   :  { %2110 = vmatmul.mubr.msk.f32.vlgmr.msra.gmra.mxu1 %vm63_vm0, %v466_v62 }
 0x552   :  { %2124 = vmatpush3.msra.mxu1 %v710_v40 }
 0x553   :  { %2125 = vmatprep.subr.mxu1 %v709_v41 }
 0x554   :  { %2126 = vmatpush3.msra.mxu1 %v709_v41 }
 0x555   :  { %2127 = vmatprep.subr.mxu1 %v708_v44 }
 0x556   :  { %2128 = vmatpush3.msra.mxu1 %v708_v44 }
 0x557   :  { %2129 = vmatprep.subr.mxu1 %v707_v45 }
 0x558   :  { %2130 = vmatpush3.msra.mxu1 %v707_v45 }
 0x559   :  { %2131 = vmatprep.subr.mxu1 %v706_v46 }
 0x55a   :  { %2132 = vmatpush3.msra.mxu1 %v706_v46 }
 0x55b   :  { %2133 = vmatprep.subr.mxu1 %v705_v47 }
 0x55c   :  { %2134 = vmatpush3.msra.mxu1 %v705_v47 }
 0x55d   :  { %2135 = vmatprep.subr.mxu1 %v704_v49 }
 0x55e   :  { %2136 = vmatpush3.msra.mxu1 %v704_v49  ;;  %v1917_v49 = vld [vmem:[%s2855_s1 + $0x8] ss:$0 sm:$0xff] }
 0x55f   :  { %2137 = vmatprep.subr.mxu1 %v703_v50 }
 0x560   :  { %2138 = vmatpush3.msra.mxu1 %v703_v50 }
 0x611   :  { %v2111_v0 = vpop.f32.mrf.mxu1 }
 0x612   :  { %v553_v1 = vadd.f32 %v2111_v0, %v1906_v63 }
 0x613   :  { %v547_v2 = vpop.f32.mrf.mxu1 }
 0x614   :  { %v548_v3 = vadd.f32 %v1906_v63, %v547_v2  ;;  %v557_v4 = vadd.f32 %v553_v1, %v2461_v33 }
 0x616   :  { %v561_v5 = vsel %vm63_vm0, %v557_v4, 0.0  ;;  %v556_v6 = vadd.f32 %v548_v3, %v2457_v31  ;;  %v599_v31 = vld [vmem:[%s2858_s4 + $0x18] sm:$0xff] }
 0x617   :  { %562 = vadd.xlane.f32.xlu0 %v561_v5  ;;  %2112 = vmatprep.subr.mxu0 %v599_v31 }
 0x618   :  { %v558_v7 = vsel %vm63_vm0, %v556_v6, 0.0  ;;  %2113 = vmatpush3.msra.mxu0 %v599_v31 }
 0x619   :  { %559 = vadd.xlane.f32.xlu1 %v558_v7  ;;  %2114 = vmatprep.subr.mxu0 %v598_v17 }
 0x61a   :  { %2115 = vmatpush3.msra.mxu0 %v598_v17 }
 0x61b   :  { %2116 = vmatprep.subr.mxu0 %v597_v18 }
 0x61c   :  { %2117 = vmatpush3.msra.mxu0 %v597_v18 }
 0x61d   :  { %2118 = vmatprep.subr.mxu0 %v596_v19 }
 0x61e   :  { %2119 = vmatpush3.msra.mxu0 %v596_v19 }
 0x6a0   :  { %v563_v8 = vpop.xlane.xlu0 %562 }
 0x6a1   :  { %v565_v9 = vmul.f32 0.03125, %v563_v8 }
 0x6a2   :  { %v560_v10 = vpop.xlane.xlu1 %559 }
 0x6a3   :  { %v567_v11 = vsub.f32 %v557_v4, %v565_v9  ;;  %v564_v12 = vmul.f32 0.03125, %v560_v10 }
 0x6a5   :  { %v566_v13 = vsub.f32 %v556_v6, %v564_v12  ;;  %v569_v14 = vmul.f32 %v567_v11, %v567_v11 }
 0x6a7   :  { %v573_v15 = vsel %vm63_vm0, %v569_v14, 0.0  ;;  %v568_v16 = vmul.f32 %v566_v13, %v566_v13  ;;  %v1914_v14 = vld [vmem:[%s2855_s1 + $0x7] ss:$0 sm:$0xff] }
 0x6a8   :  { %574 = vadd.xlane.f32.xlu1 %v573_v15 }
 0x6a9   :  { %v570_v33 = vsel %vm63_vm0, %v568_v16, 0.0 }
 0x6aa   :  { %571 = vadd.xlane.f32.xlu0 %v570_v33 }
 0x731   :  { %v575_v20 = vpop.xlane.xlu1 %574 }
 0x732   :  { %v577_v21 = vmul.f32 0.03125, %v575_v20 }
 0x733   :  { %v572_v22 = vpop.xlane.xlu0 %571 }
 0x734   :  { %v579_v23 = vadd.f32 1e-12, %v577_v21  ;;  %v576_v24 = vmul.f32 0.03125, %v572_v22 }
 0x736   :  { %2270 = vrsqrt.f32 %v579_v23  ;;  %v578_v25 = vadd.f32 1e-12, %v576_v24 }
 0x738   :  { %2272 = vrsqrt.f32 %v578_v25 }
 0x743   :  { %v2271_v26 = vpop.eup %2270 }
 0x744   :  { %v583_v28 = vmul.f32 %v2271_v26, %v567_v11 }
 0x745   :  { %v2273_v29 = vpop.eup %2272 }
 0x746   :  { %v582_v30 = vmul.f32 %v2273_v29, %v566_v13  ;;  %v589_v32 = vmul.f32 %v1909_v27, %v583_v28 }
 0x748   :  { %v588_v37 = vmul.f32 %v1909_v27, %v582_v30  ;;  %v595_v39 = vadd.f32 %v1910_v35, %v589_v32  ;;  %v1922_v32 = vld [vmem:[%s2856_s2 + $0x38] sm:$0xff] }
 0x749   :  { %2142 = vmatprep.subr.mxu0 %v1922_v32 }
 0x74a   :  { %v2587_v38 = vadd.f32 %v1910_v35, %v588_v37  ;;  %v1921_v35 = vld [vmem:[%s2856_s2 + $0x30] sm:$0xff]  ;;  %v1920_v37 = vld [vmem:[%s2856_s2 + $0x28] sm:$0xff] }
 0x74c   :  { %2120 = vmatprep.mubr.msk.f32.mxu0 %vm63_vm0, %v2587_v38 }
 0x74d   :  { %2121 = vmatmul.mubr.msk.f32.vlgmr.msra.gmra.mxu0 %vm63_vm0, %v595_v39 }
 0x74e   :  { %2143 = vmatpush3.msra.mxu0 %v1922_v32 }
 0x74f   :  { %2144 = vmatprep.subr.mxu0 %v1921_v35 }
 0x750   :  { %2145 = vmatpush3.msra.mxu0 %v1921_v35 }
 0x751   :  { %2146 = vmatprep.subr.mxu0 %v1920_v37 }
 0x752   :  { %2147 = vmatpush3.msra.mxu0 %v1920_v37 }
 0x80d   :  { %v2122_v53 = vpop.f32.mrf.mxu0 }
 0x80e   :  { %v682_v55 = vadd.f32 %v2122_v53, %v1911_v51 }
 0x80f   :  { %v676_v56 = vpop.f32.mrf.mxu0 }
 0x810   :  { %v686_v58 = vmul.f32 %v682_v55, %v682_v55  ;;  %v677_v59 = vadd.f32 %v1911_v51, %v676_v56  ;;  %v1918_v56 = vld [vmem:[%s2855_s1 + $0x9] ss:$0 sm:$0xff] }
 0x812   :  { %v688_v60 = vmul.f32 %v686_v58, %v682_v55  ;;  %v685_v62 = vmul.f32 %v677_v59, %v677_v59 }
 0x814   :  { %v690_v63 = vmul.f32 0.044715, %v688_v60  ;;  %v687_v0 = vmul.f32 %v685_v62, %v677_v59  ;;  %v1923_v62 = vld [vmem:[%s2855_s1 + $0xa] ss:$0 sm:$0xff] }
 0x816   :  { %v692_v1 = vadd.f32 %v690_v63, %v682_v55  ;;  %v689_v2 = vmul.f32 0.044715, %v687_v0 }
 0x818   :  { %v694_v3 = vmul.f32 0.7978846, %v692_v1  ;;  %v691_v4 = vadd.f32 %v689_v2, %v677_v59 }
 0x81a   :  { %2274 = vtanh.f32 %v694_v3  ;;  %v693_v5 = vmul.f32 0.7978846, %v691_v4 }
 0x81c   :  { %2276 = vtanh.f32 %v693_v5 }
 0x827   :  { %v2275_v6 = vpop.eup %2274 }
 0x828   :  { %v698_v7 = vadd.f32 1.0, %v2275_v6 }
 0x829   :  { %v2277_v8 = vpop.eup %2276 }
 0x82a   :  { %v697_v9 = vadd.f32 1.0, %v2277_v8  ;;  %v700_v10 = vmul.f32 0.5, %v698_v7 }
 0x82c   :  { %v699_v11 = vmul.f32 0.5, %v697_v9  ;;  %v702_v13 = vmul.f32 %v700_v10, %v682_v55 }
 0x82e   :  { %v701_v12 = vmul.f32 %v699_v11, %v677_v59 }
 0x830   :  { %2139 = vmatprep.mubr.msk.f32.mxu1 %vm715_vm6, %v701_v12 }
 0x831   :  { %2140 = vmatmul.mubr.msk.f32.vlgmr.msra.gmra.mxu1 %vm715_vm6, %v702_v13 }
 0x8f1   :  { %v2141_v15 = vpop.f32.mrf.mxu1 }
 0x8f2   :  { %v794_v16 = vadd.f32 %v2141_v15, %v1914_v14 }
 0x8f3   :  { %v788_v33 = vpop.f32.mrf.mxu1 }
 0x8f4   :  { %v789_v31 = vadd.f32 %v1914_v14, %v788_v33  ;;  %v798_v17 = vadd.f32 %v794_v16, %v595_v39 }
 0x8f6   :  { %v802_v18 = vsel %vm63_vm0, %v798_v17, 0.0  ;;  %v797_v19 = vadd.f32 %v789_v31, %v2587_v38  ;;  %v1919_v38 = vld [vmem:[%s2856_s2 + $0x20] sm:$0xff] }
 0x8f7   :  { %803 = vadd.xlane.f32.xlu1 %v802_v18  ;;  %2148 = vmatprep.subr.mxu0 %v1919_v38 }
 0x8f8   :  { %v799_v20 = vsel %vm63_vm0, %v797_v19, 0.0  ;;  %2149 = vmatpush3.msra.mxu0 %v1919_v38 }
 0x8f9   :  { %800 = vadd.xlane.f32.xlu0 %v799_v20 }
 0x980   :  { %v804_v21 = vpop.xlane.xlu1 %803 }
 0x981   :  { %v806_v22 = vmul.f32 0.03125, %v804_v21 }
 0x982   :  { %v801_v23 = vpop.xlane.xlu0 %800 }
 0x983   :  { %v808_v24 = vsub.f32 %v798_v17, %v806_v22  ;;  %v805_v25 = vmul.f32 0.03125, %v801_v23 }
 0x985   :  { %v807_v26 = vsub.f32 %v797_v19, %v805_v25  ;;  %v810_v27 = vmul.f32 %v808_v24, %v808_v24 }
 0x987   :  { %v814_v28 = vsel %vm63_vm0, %v810_v27, 0.0  ;;  %v809_v29 = vmul.f32 %v807_v26, %v807_v26 }
 0x988   :  { %815 = vadd.xlane.f32.xlu1 %v814_v28 }
 0x989   :  { %v811_v30 = vsel %vm63_vm0, %v809_v29, 0.0 }
 0x98a   :  { %812 = vadd.xlane.f32.xlu0 %v811_v30 }
 0xa11   :  { %v816_v39 = vpop.xlane.xlu1 %815 }
 0xa12   :  { %v818_v40 = vmul.f32 0.03125, %v816_v39 }
 0xa13   :  { %v813_v41 = vpop.xlane.xlu0 %812 }
 0xa14   :  { %v820_v44 = vadd.f32 1e-12, %v818_v40  ;;  %v817_v45 = vmul.f32 0.03125, %v813_v41 }
 0xa16   :  { %2278 = vrsqrt.f32 %v820_v44  ;;  %v819_v46 = vadd.f32 1e-12, %v817_v45 }
 0xa18   :  { %2280 = vrsqrt.f32 %v819_v46 }
 0xa23   :  { %v2279_v47 = vpop.eup %2278 }
 0xa24   :  { %v824_v50 = vmul.f32 %v2279_v47, %v808_v24 }
 0xa25   :  { %v2281_v51 = vpop.eup %2280 }
 0xa26   :  { %v823_v53 = vmul.f32 %v2281_v51, %v807_v26  ;;  %v830_v55 = vmul.f32 %v1917_v49, %v824_v50 }
 0xa28   :  { %v829_v58 = vmul.f32 %v1917_v49, %v823_v53  ;;  %v2649_v60 = vadd.f32 %v1918_v56, %v830_v55 }
 0xa2a   :  { %v2647_v59 = vadd.f32 %v1918_v56, %v829_v58 }
 0xa2c   :  { %2150 = vmatprep.mubr.msk.f32.mxu0 %vm63_vm0, %v2647_v59 }
 0xa2d   :  { %2151 = vmatmul.mubr.msk.f32.vlgmr.msra.gmra.mxu0 %vm63_vm0, %v2649_v60 }
 0xaed   :  { %v2152_v63 = vpop.f32.mrf.mxu0 }
 0xaee   :  { %v2658_v0 = vadd.f32 %v2152_v63, %v1923_v62 }
 0xaef   :  { %v926_v1 = vpop.f32.mrf.mxu0 }
 0xaf0   :  { %v927_v2 = vadd.f32 %v1923_v62, %v926_v1  ;;  %945 = vrot.lane.b32.xlu0 %v2658_v0, %s2375_s26  ;;  %v936_v7 = vmul.f32 0.25, %v2658_v0  ;;  %v1938_v1 = vld [vmem:[%s2857_s3 + $0x30] sm:$0xff] }
 0xaf2   :  { %v935_v3 = vmul.f32 0.25, %v927_v2  ;;  %943 = vrot.lane.b32.xlu1 %v927_v2, %s2375_s26  ;;  %v938_v8 = vmul.f32 %v2482_v43, %v936_v7  ;;  %v940_v10 = vmul.f32 %v2494_v48, %v936_v7 }
 0xaf4   :  { %v937_v4 = vmul.f32 %v2482_v43, %v935_v3  ;;  %v939_v9 = vmul.f32 %v2494_v48, %v935_v3  ;;  %v1936_v3 = vld [vmem:[%s2857_s3 + $0x20] sm:$0xff] }
 0xaf6   :  { %2157 = vmatprep.mubr.msk.f32.mxu0 %vm63_vm0, %v937_v4 }
 0xb62   :  { %v946_v5 = vpop.permute.xlu0 %945 }
 0xb63   :  { %2153 = vmatprep.subr.msk.mxu0 %vm63_vm0, %v946_v5 }
 0xb64   :  { %2154 = vmatpush3.xpose.msk.msra.mxu0 %vm63_vm0, %v946_v5  ;;  %v944_v6 = vpop.permute.xlu1 %943 }
 0xb65   :  { %2155 = vmatprep.subr.msk.mxu0 %vm63_vm0, %v944_v6 }
 0xb68   :  { %2156 = vmatpush3.xpose.msk.msra.mxu0 %vm63_vm0, %v944_v6 }
 0xb6b   :  { %2158 = vmatmul.mubr.msk.f32.vlgmr.msra.gmra.mxu0 %vm63_vm0, %v938_v8 }
 0xb6c   :  { %2160 = vmatprep.mubr.msk.f32.mxu0 %vm63_vm0, %v939_v9 }
 0xb6f   :  { %2161 = vmatmul.mubr.msk.f32.gmra.mxu0 %vm63_vm0, %v940_v10 }
 0xc2b   :  { %v2159_v11 = vpop.f32.mrf.mxu0 }
 0xc2c   :  { %v1035_v12 = vadd.f32 %v2159_v11, %v2505_v52 }
 0xc2d   :  { %v1029_v13 = vpop.f32.mrf.mxu0 }
 0xc2e   :  { %v1030_v14 = vadd.f32 %v1029_v13, %v2510_v54  ;;  %v1051_v15 = vsel %vm313_vm5, %v1035_v12, -inf }
 0xc2f   :  { %1052 = vmax.xlane.f32.xlu0 %v1051_v15  ;;  %v2162_v16 = vpop.f32.mrf.mxu0 }
 0xc30   :  { %v1045_v33 = vadd.f32 %v2162_v16, %v2516_v57  ;;  %v1048_v31 = vsel %vm313_vm5, %v1030_v14, -inf }
 0xc31   :  { %v1039_v17 = vpop.f32.mrf.mxu0  ;;  %1049 = vmax.xlane.f32.xlu1 %v1048_v31 }
 0xc32   :  { %v1040_v18 = vadd.f32 %v1039_v17, %v2523_v61  ;;  %v1057_v20 = vsel %vm313_vm5, %v1045_v33, -inf }
 0xc34   :  { %v1054_v19 = vsel %vm313_vm5, %v1040_v18, -inf }
 0xc35   :  { %1055 = vmax.xlane.f32.xlu0 %v1054_v19  ;;  %1058 = vmax.xlane.f32.xlu1 %v1057_v20 }
 0xcb8   :  { %v1053_v52 = vpop.xlane.xlu0 %1052 }
 0xcb9   :  { %v1061_v54 = vsub.f32 %v1035_v12, %v1053_v52 }
 0xcba   :  { %v1050_v21 = vpop.xlane.xlu1 %1049 }
 0xcbb   :  { %v1066_v22 = vmul.f32 1.442695, %v1061_v54  ;;  %v1060_v23 = vsub.f32 %v1030_v14, %v1050_v21  ;;  %v1940_v14 = vld [vmem:[%s2855_s1 + $0xb] ss:$0 sm:$0xff] }
 0xcbd   :  { %2282 = vpow2.f32 %v1066_v22  ;;  %v1064_v24 = vmul.f32 1.442695, %v1060_v23 }
 0xcbe   :  { %v1056_v57 = vpop.xlane.xlu0 %1055  ;;  %v1059_v25 = vpop.xlane.xlu1 %1058 }
 0xcbf   :  { %2284 = vpow2.f32 %v1064_v24  ;;  %v1062_v26 = vsub.f32 %v1040_v18, %v1056_v57  ;;  %v1063_v27 = vsub.f32 %v1045_v33, %v1059_v25  ;;  %v1947_v25 = vld [vmem:[%s2858_s4 + $0x30] sm:$0xff] }
 0xcc1   :  { %v1068_v28 = vmul.f32 1.442695, %v1062_v26  ;;  %v1070_v61 = vmul.f32 1.442695, %v1063_v27  ;;  %v1946_v26 = vld [vmem:[%s2858_s4 + $0x28] sm:$0xff]  ;;  %v1945_v27 = vld [vmem:[%s2858_s4 + $0x20] sm:$0xff] }
 0xcc3   :  { %2286 = vpow2.f32 %v1068_v28 }
 0xcc4   :  { %2288 = vpow2.f32 %v1070_v61 }
 0xcca   :  { %v2283_v29 = vpop.eup %2282 }
 0xccb   :  { %v1075_v30 = vsel %vm313_vm5, %v2283_v29, 0.0 }
 0xccc   :  { %v2285_v32 = vpop.eup %2284  ;;  %1076 = vadd.xlane.f32.xlu1 %v1075_v30 }
 0xccd   :  { %v1072_v35 = vsel %vm313_vm5, %v2285_v32, 0.0 }
 0xcce   :  { %1073 = vadd.xlane.f32.xlu0 %v1072_v35 }
 0xcd0   :  { %v2287_v37 = vpop.eup %2286 }
 0xcd1   :  { %v2289_v38 = vpop.eup %2288  ;;  %v1078_v39 = vsel %vm313_vm5, %v2287_v37, 0.0 }
 0xcd2   :  { %1079 = vadd.xlane.f32.xlu0 %v1078_v39  ;;  %v1081_v40 = vsel %vm313_vm5, %v2289_v38, 0.0 }
 0xcd3   :  { %1082 = vadd.xlane.f32.xlu1 %v1081_v40 }
 0xce4   :  { %1092 = vrot.lane.b32.xlu1 %v927_v2, %s2377_s6  ;;  %v1937_v2 = vld [vmem:[%s2857_s3 + $0x28] sm:$0xff] }
 0xce8   :  { %1094 = vrot.lane.b32.xlu0 %v2658_v0, %s2377_s6  ;;  %v1939_v0 = vld [vmem:[%s2857_s3 + $0x38] sm:$0xff] }
 0xce9   :  { %2173 = vmatprep.subr.mxu0 %v1939_v0 }
 0xcea   :  { %2174 = vmatpush3.msra.mxu0 %v1939_v0  ;;  %v1949_v0 = vld [vmem:[%s2855_s1 + $0xe] ss:$0 sm:$0xff] }
 0xceb   :  { %2175 = vmatprep.subr.mxu0 %v1938_v1 }
 0xcec   :  { %2176 = vmatpush3.msra.mxu0 %v1938_v1 }
 0xced   :  { %2177 = vmatprep.subr.mxu0 %v1937_v2 }
 0xcee   :  { %2178 = vmatpush3.msra.mxu0 %v1937_v2 }
 0xcef   :  { %2179 = vmatprep.subr.mxu0 %v1936_v3 }
 0xcf0   :  { %2180 = vmatpush3.msra.mxu0 %v1936_v3 }
 0xd55   :  { %v1077_v41 = vpop.xlane.xlu1 %1076 }
 0xd56   :  { %2290 = vrcp.f32 %v1077_v41 }
 0xd57   :  { %v1074_v44 = vpop.xlane.xlu0 %1073 }
 0xd58   :  { %2292 = vrcp.f32 %v1074_v44 }
 0xd5b   :  { %v1080_v45 = vpop.xlane.xlu0 %1079 }
 0xd5c   :  { %2294 = vrcp.f32 %v1080_v45  ;;  %v1083_v46 = vpop.xlane.xlu1 %1082  ;;  %v1944_v45 = vld [vmem:[%s2855_s1 + $0xd] ss:$0 sm:$0xff] }
 0xd5d   :  { %2296 = vrcp.f32 %v1083_v46 }
 0xd5f   :  { %v1095_v47 = vpop.permute.xlu0 %1094 }
 0xd60   :  { %2163 = vmatprep.subr.mxu1 %v1095_v47  ;;  %v1093_v49 = vpop.permute.xlu1 %1092 }
 0xd61   :  { %2164 = vmatpush3.msra.mxu1 %v1095_v47 }
 0xd62   :  { %2165 = vmatprep.subr.mxu1 %v1093_v49 }
 0xd63   :  { %2166 = vmatpush3.msra.mxu1 %v1093_v49  ;;  %v2291_v50 = vpop.eup %2290 }
 0xd64   :  { %v1089_v55 = vmul.f32 %v2291_v50, %v2283_v29  ;;  %v1959_v50 = vld [vmem:[%s2859_s5 + $0x78] sm:$0xff] }
 0xd65   :  { %v2293_v51 = vpop.eup %2292  ;;  %2195 = vmatprep.subr.mxu0 %v1959_v50 }
 0xd66   :  { %v1088_v53 = vmul.f32 %v2293_v51, %v2285_v32  ;;  %v1958_v51 = vld [vmem:[%s2859_s5 + $0x70] sm:$0xff] }
 0xd68   :  { %2167 = vmatprep.mubr.msk.f32.mxu1 %vm313_vm5, %v1088_v53  ;;  %v1957_v53 = vld [vmem:[%s2859_s5 + $0x68] sm:$0xff] }
 0xd69   :  { %v2295_v56 = vpop.eup %2294  ;;  %2168 = vmatmul.mubr.msk.f32.vlgmr.msra.gmra.mxu1 %vm313_vm5, %v1089_v55  ;;  %v1956_v55 = vld [vmem:[%s2859_s5 + $0x60] sm:$0xff] }
 0xd6a   :  { %v2297_v58 = vpop.eup %2296  ;;  %v1090_v62 = vmul.f32 %v2295_v56, %v2287_v37  ;;  %v1955_v56 = vld [vmem:[%s2859_s5 + $0x58] sm:$0xff] }
 0xd6b   :  { %v1091_v63 = vmul.f32 %v2297_v58, %v2289_v38  ;;  %v1943_v38 = vld [vmem:[%s2855_s1 + $0xc] ss:$0 sm:$0xff]  ;;  %v1954_v58 = vld [vmem:[%s2859_s5 + $0x50] sm:$0xff] }
 0xd6c   :  { %2170 = vmatprep.mubr.msk.f32.mxu1 %vm313_vm5, %v1090_v62  ;;  %v1953_v62 = vld [vmem:[%s2859_s5 + $0x48] sm:$0xff] }
 0xd6d   :  { %2171 = vmatmul.mubr.msk.f32.gmra.mxu1 %vm313_vm5, %v1091_v63  ;;  %v1952_v63 = vld [vmem:[%s2859_s5 + $0x40] sm:$0xff] }
 0xe29   :  { %v2169_v4 = vpop.f32.mrf.mxu1 }
 0xe2a   :  { %v1196_v11 = vmul.f32 %v2169_v4, %v2482_v43 }
 0xe2b   :  { %v1176_v5 = vpop.f32.mrf.mxu1 }
 0xe2c   :  { %v1195_v9 = vmul.f32 %v2482_v43, %v1176_v5 }
 0xe2d   :  { %v2172_v6 = vpop.f32.mrf.mxu1 }
 0xe2e   :  { %v1198_v7 = vmul.f32 %v2172_v6, %v2494_v48 }
 0xe2f   :  { %v1186_v8 = vpop.f32.mrf.mxu1 }
 0xe30   :  { %v1197_v10 = vmul.f32 %v2494_v48, %v1186_v8  ;;  %v1200_v13 = vadd.f32 %v1198_v7, %v1196_v11 }
 0xe32   :  { %v1199_v12 = vadd.f32 %v1197_v10, %v1195_v9 }
 0xe34   :  { %2181 = vmatprep.mubr.msk.f32.mxu0 %vm63_vm0, %v1199_v12 }
 0xe35   :  { %2182 = vmatmul.mubr.msk.f32.vlgmr.msra.gmra.mxu0 %vm63_vm0, %v1200_v13 }
 0xe36   :  { %2196 = vmatpush3.msra.mxu0 %v1959_v50 }
 0xe37   :  { %2197 = vmatprep.subr.mxu0 %v1958_v51 }
 0xe38   :  { %2198 = vmatpush3.msra.mxu0 %v1958_v51  ;;  %v1964_v51 = vld [vmem:[%s2855_s1 + $0x11] ss:$0 sm:$0xff] }
 0xe39   :  { %2199 = vmatprep.subr.mxu0 %v1957_v53 }
 0xe3a   :  { %2200 = vmatpush3.msra.mxu0 %v1957_v53 }
 0xe3b   :  { %2201 = vmatprep.subr.mxu0 %v1956_v55 }
 0xe3c   :  { %2202 = vmatpush3.msra.mxu0 %v1956_v55 }
 0xe3d   :  { %2203 = vmatprep.subr.mxu0 %v1955_v56 }
 0xe3e   :  { %2204 = vmatpush3.msra.mxu0 %v1955_v56 }
 0xe3f   :  { %2205 = vmatprep.subr.mxu0 %v1954_v58 }
 0xe40   :  { %2206 = vmatpush3.msra.mxu0 %v1954_v58 }
 0xe41   :  { %2207 = vmatprep.subr.mxu0 %v1953_v62 }
 0xe42   :  { %2208 = vmatpush3.msra.mxu0 %v1953_v62 }
 0xe43   :  { %2209 = vmatprep.subr.mxu0 %v1952_v63 }
 0xe44   :  { %2210 = vmatpush3.msra.mxu0 %v1952_v63  ;;  %v1970_v63 = vld [vmem:[%s2857_s3 + $0x58] sm:$0xff] }
 0xef5   :  { %v2183_v15 = vpop.f32.mrf.mxu0 }
 0xef6   :  { %v1288_v16 = vadd.f32 %v2183_v15, %v1940_v14 }
 0xef7   :  { %v1282_v33 = vpop.f32.mrf.mxu0 }
 0xef8   :  { %v1283_v31 = vadd.f32 %v1940_v14, %v1282_v33  ;;  %v1292_v17 = vadd.f32 %v1288_v16, %v2649_v60 }
 0xefa   :  { %v1296_v48 = vsel %vm63_vm0, %v1292_v17, 0.0  ;;  %v1291_v43 = vadd.f32 %v1283_v31, %v2647_v59  ;;  %v1948_v59 = vld [vmem:[%s2858_s4 + $0x38] sm:$0xff] }
 0xefb   :  { %1297 = vadd.xlane.f32.xlu0 %v1296_v48  ;;  %2184 = vmatprep.subr.mxu1 %v1948_v59 }
 0xefc   :  { %v1293_v18 = vsel %vm63_vm0, %v1291_v43, 0.0  ;;  %2185 = vmatpush3.msra.mxu1 %v1948_v59 }
 0xefd   :  { %1294 = vadd.xlane.f32.xlu1 %v1293_v18  ;;  %2186 = vmatprep.subr.mxu1 %v1947_v25 }
 0xefe   :  { %2187 = vmatpush3.msra.mxu1 %v1947_v25 }
 0xeff   :  { %2188 = vmatprep.subr.mxu1 %v1946_v26 }
 0xf00   :  { %2189 = vmatpush3.msra.mxu1 %v1946_v26 }
 0xf01   :  { %2190 = vmatprep.subr.mxu1 %v1945_v27 }
 0xf02   :  { %2191 = vmatpush3.msra.mxu1 %v1945_v27 }
 0xf03   :  { %2214 = vmatprep.subr.mxu1 %v2376_v42 }
 0xf84   :  { %v1298_v19 = vpop.xlane.xlu0 %1297 }
 0xf85   :  { %v1300_v20 = vmul.f32 0.03125, %v1298_v19  ;;  %v1960_v19 = vld [vmem:[%s2855_s1 + $0xf] ss:$0 sm:$0xff] }
 0xf86   :  { %v1295_v52 = vpop.xlane.xlu1 %1294 }
 0xf87   :  { %v1302_v54 = vsub.f32 %v1292_v17, %v1300_v20  ;;  %v1299_v21 = vmul.f32 0.03125, %v1295_v52 }
 0xf89   :  { %v1301_v22 = vsub.f32 %v1291_v43, %v1299_v21  ;;  %v1304_v23 = vmul.f32 %v1302_v54, %v1302_v54 }
 0xf8b   :  { %v1308_v24 = vsel %vm63_vm0, %v1304_v23, 0.0  ;;  %v1303_v57 = vmul.f32 %v1301_v22, %v1301_v22 }
 0xf8c   :  { %1309 = vadd.xlane.f32.xlu1 %v1308_v24 }
 0xf8d   :  { %v1305_v60 = vsel %vm63_vm0, %v1303_v57, 0.0 }
 0xf8e   :  { %1306 = vadd.xlane.f32.xlu0 %v1305_v60 }
0x1015   :  { %v1310_v28 = vpop.xlane.xlu1 %1309 }
0x1016   :  { %v1312_v61 = vmul.f32 0.03125, %v1310_v28 }
0x1017   :  { %v1307_v29 = vpop.xlane.xlu0 %1306 }
0x1018   :  { %v1314_v30 = vadd.f32 1e-12, %v1312_v61  ;;  %v1311_v32 = vmul.f32 0.03125, %v1307_v29 }
0x101a   :  { %2298 = vrsqrt.f32 %v1314_v30  ;;  %v1313_v35 = vadd.f32 1e-12, %v1311_v32 }
0x101c   :  { %2300 = vrsqrt.f32 %v1313_v35 }
0x1027   :  { %v2299_v37 = vpop.eup %2298 }
0x1028   :  { %v1318_v39 = vmul.f32 %v2299_v37, %v1302_v54 }
0x1029   :  { %v2301_v40 = vpop.eup %2300 }
0x102a   :  { %v1317_v41 = vmul.f32 %v2301_v40, %v1301_v22  ;;  %v1324_v44 = vmul.f32 %v1943_v38, %v1318_v39 }
0x102c   :  { %v1323_v46 = vmul.f32 %v1943_v38, %v1317_v41  ;;  %v1330_v49 = vadd.f32 %v1944_v45, %v1324_v44  ;;  %v2782_v44 = vshrl.u32 %v43_v34, 7 }
0x102e   :  { %v1329_v47 = vadd.f32 %v1944_v45, %v1323_v46  ;;  %v1963_v46 = vld [vmem:[%s2855_s1 + $0x10] ss:$0 sm:$0xff]  ;;  %vm1834_vm9 = vcmp.eq.s32.totalorder %v2782_v44, 0  ;;  %vm1838_vm10 = vcmp.eq.s32.totalorder %v2782_v44, 1 }
0x1030   :  { %2192 = vmatprep.mubr.msk.f32.mxu1 %vm63_vm0, %v1329_v47 }
0x1031   :  { %2193 = vmatmul.mubr.msk.f32.vlgmr.msra.gmra.mxu1 %vm63_vm0, %v1330_v49 }
0x1032   :  { %2218 = vmatprep.mubr.msk.f32.mxu1 %vm2378_vm7, %v2376_v42 }
0x10f1   :  { %v2194_v1 = vpop.f32.mrf.mxu1 }
0x10f2   :  { %v1418_v2 = vadd.f32 %v2194_v1, %v1949_v0  ;;  %v1968_v1 = vld [vmem:[%s2857_s3 + $0x48] sm:$0xff] }
0x10f3   :  { %v1412_v3 = vpop.f32.mrf.mxu1 }
0x10f4   :  { %v1422_v4 = vmul.f32 %v1418_v2, %v1418_v2  ;;  %v1413_v5 = vadd.f32 %v1949_v0, %v1412_v3  ;;  %v1969_v0 = vld [vmem:[%s2857_s3 + $0x50] sm:$0xff] }
0x10f6   :  { %v1424_v6 = vmul.f32 %v1422_v4, %v1418_v2  ;;  %v1421_v7 = vmul.f32 %v1413_v5, %v1413_v5 }
0x10f8   :  { %v1426_v8 = vmul.f32 0.044715, %v1424_v6  ;;  %v1423_v9 = vmul.f32 %v1421_v7, %v1413_v5  ;;  %v1738_v6 = vld [vmem:[%s2855_s1 + $0x48] sm:$0xff]  ;;  %v1737_v7 = vld [vmem:[%s2855_s1 + $0x40] sm:$0xff] }
0x10fa   :  { %v1428_v10 = vadd.f32 %v1426_v8, %v1418_v2  ;;  %v1425_v11 = vmul.f32 0.044715, %v1423_v9  ;;  %v1736_v8 = vld [vmem:[%s2855_s1 + $0x38] sm:$0xff]  ;;  %v1971_v9 = vld [vmem:[%s2855_s1 + $0x12] ss:$0 sm:$0xff] }
0x10fc   :  { %v1430_v12 = vmul.f32 0.7978846, %v1428_v10  ;;  %v1427_v13 = vadd.f32 %v1425_v11, %v1413_v5 }
0x10fe   :  { %2302 = vtanh.f32 %v1430_v12  ;;  %v1429_v14 = vmul.f32 0.7978846, %v1427_v13 }
0x1100   :  { %2304 = vtanh.f32 %v1429_v14  ;;  %v1836_v14 = vstv %s1835_s10 }
0x110b   :  { %v2303_v15 = vpop.eup %2302 }
0x110c   :  { %v1434_v16 = vadd.f32 1.0, %v2303_v15  ;;  %v1837_v15 = vsel %vm1834_vm9, %v1836_v14, 0 }
0x110d   :  { %v2305_v33 = vpop.eup %2304 }
0x110e   :  { %v1433_v31 = vadd.f32 1.0, %v2305_v33  ;;  %v1436_v17 = vmul.f32 0.5, %v1434_v16  ;;  %v1840_v16 = vstv %s1975_s11 }
0x110f   :  { %v1841_v33 = vsel %vm1838_vm10, %v1840_v16, %v1837_v15 }
0x1110   :  { %v1435_v48 = vmul.f32 0.5, %v1433_v31  ;;  %v1438_v18 = vmul.f32 %v1436_v17, %v1418_v2  ;;  %v1967_v2 = vld [vmem:[%s2857_s3 + $0x40] sm:$0xff]  ;;  %v1973_v31 = vld [vmem:[%s2855_s1 + $0x13] ss:$0 sm:$0xff]  ;;  %vm1842_vm11 = vcmp.eq.s32.totalorder %v2469_v36, %v1841_v33 }
0x1112   :  { %v1437_v43 = vmul.f32 %v1435_v48, %v1413_v5  ;;  %v1739_v5 = vld [vmem:[%s2855_s1 + $0x50] sm:$0xff]  ;;  %s2379_s1 = smov [#allocation5]  }
0x1113   :  { %s1866_s5 = sshll.u32 %s2379_s1, 4  ;;  %s1867_s5 = int_to_ptr.vmem [resolvable:$true] %s1866_s5 }
0x1114   :  { %2211 = vmatprep.mubr.msk.f32.mxu0 %vm715_vm6, %v1437_v43  ;;  %v1976_v43 = vsel %vm1842_vm11, 1.0, %v2376_v42  ;;  %s2328_s13 = scalar_lea.vmem %s1867_s5, 32  ;;  %p2333_p6 = scmp.lt.s32.totalorder %s1867_s5, %s1867_s5 }
0x1115   :  { %2212 = vmatmul.mubr.msk.f32.vlgmr.msra.gmra.mxu0 %vm715_vm6, %v1438_v18  ;;  %p2329_p5 = scmp.ne.s32.totalorder %s1867_s5, %s2328_s13  ;;  %p2334_p7 = scmp.lt.s32.totalorder %s2328_s13, %s2328_s13 }
0x1117   :  { %p2335_p8 = por %p2334_p7, %p2333_p6 }
0x1119   :  { %p2336_p9 = pnand %p2335_p8, %p2329_p5 }
0x11d5   :  { %v2213_v20 = vpop.f32.mrf.mxu0 }
0x11d6   :  { %v1530_v52 = vadd.f32 %v2213_v20, %v1960_v19 }
0x11d7   :  { %v1524_v54 = vpop.f32.mrf.mxu0 }
0x11d8   :  { %v1525_v21 = vadd.f32 %v1960_v19, %v1524_v54  ;;  %v1534_v22 = vadd.f32 %v1530_v52, %v1330_v49 }
0x11da   :  { %v1538_v23 = vsel %vm63_vm0, %v1534_v22, 0.0  ;;  %v1533_v24 = vadd.f32 %v1525_v21, %v1329_v47  ;;  %v1575_v47 = vmul.u32 8, %v2782_v44 }
0x11db   :  { %1539 = vadd.xlane.f32.xlu0 %v1538_v23 }
0x11dc   :  { %v1535_v57 = vsel %vm63_vm0, %v1533_v24, 0.0  ;;  %vm1576_vm8 = vcmp.eq.s32.totalorder %v2469_v36, %v1575_v47 }
0x11dd   :  { %1536 = vadd.xlane.f32.xlu1 %v1535_v57  ;;  %v1965_v62 = vsel %vm1576_vm8, 1.0, %v2376_v42 }
0x1264   :  { %v1540_v60 = vpop.xlane.xlu0 %1539 }
0x1265   :  { %v1542_v59 = vmul.f32 0.03125, %v1540_v60 }
0x1266   :  { %v1537_v25 = vpop.xlane.xlu1 %1536 }
0x1267   :  { %v1544_v26 = vsub.f32 %v1534_v22, %v1542_v59  ;;  %v1541_v27 = vmul.f32 0.03125, %v1537_v25 }
0x1269   :  { %v1543_v28 = vsub.f32 %v1533_v24, %v1541_v27  ;;  %v1546_v61 = vmul.f32 %v1544_v26, %v1544_v26 }
0x126b   :  { %v1550_v29 = vsel %vm63_vm0, %v1546_v61, 0.0  ;;  %v1545_v30 = vmul.f32 %v1543_v28, %v1543_v28 }
0x126c   :  { %1551 = vadd.xlane.f32.xlu0 %v1550_v29 }
0x126d   :  { %v1547_v32 = vsel %vm63_vm0, %v1545_v30, 0.0 }
0x126e   :  { %1548 = vadd.xlane.f32.xlu1 %v1547_v32 }
0x12f5   :  { %v1552_v35 = vpop.xlane.xlu0 %1551 }
0x12f6   :  { %v1554_v37 = vmul.f32 0.03125, %v1552_v35 }
0x12f7   :  { %v1549_v38 = vpop.xlane.xlu1 %1548 }
0x12f8   :  { %v1556_v39 = vadd.f32 1e-12, %v1554_v37  ;;  %v1553_v40 = vmul.f32 0.03125, %v1549_v38 }
0x12fa   :  { %2306 = vrsqrt.f32 %v1556_v39  ;;  %v1555_v41 = vadd.f32 1e-12, %v1553_v40 }
0x12fc   :  { %2308 = vrsqrt.f32 %v1555_v41 }
0x1307   :  { %v2307_v45 = vpop.eup %2306 }
0x1308   :  { %v1560_v49 = vmul.f32 %v2307_v45, %v1544_v26 }
0x1309   :  { %v2309_v50 = vpop.eup %2308 }
0x130a   :  { %v1566_v53 = vmul.f32 %v1963_v46, %v1560_v49  ;;  %v1559_v55 = vmul.f32 %v2309_v50, %v1543_v28 }
0x130c   :  { %v1572_v56 = vadd.f32 %v1964_v51, %v1566_v53  ;;  %v1565_v34 = vmul.f32 %v1963_v46, %v1559_v55 }
0x130e   :  { %2215 = vmatpush3.msra.mxu1 %v1572_v56  ;;  %v1571_v58 = vadd.f32 %v1964_v51, %v1565_v34 }
0x130f   :  { %2216 = vmatprep.subr.mxu1 %v2376_v42 }
0x1310   :  { %2217 = vmatpush3.msra.mxu1 %v1571_v58 }
0x1311   :  { %2219 = vmatmul.mubr.msk.f32.vlgmr.msra.gmra.mxu1 %vm313_vm5, %v1965_v62  ;;  %2221 = vmatprep.subr.mxu1 %v2376_v42 }
0x1312   :  { %2222 = vmatpush3.msra.mxu1 %v1970_v63  ;;  %2229 = vmatprep.mubr.msk.f32.mxu1 %vm2378_vm7, %v2376_v42 }
0x1313   :  { %2223 = vmatprep.subr.mxu1 %v2376_v42 }
0x1314   :  { %2224 = vmatpush3.msra.mxu1 %v1969_v0 }
0x1315   :  { %2225 = vmatprep.subr.mxu1 %v2376_v42 }
0x1316   :  { %2226 = vmatpush3.msra.mxu1 %v1968_v1 }
0x1317   :  { %2227 = vmatprep.subr.mxu1 %v2376_v42 }
0x1318   :  { %2228 = vmatpush3.msra.mxu1 %v1967_v2 }
0x1319   :  { %2232 = vmatprep.subr.mxu1 %v2376_v42 }
0x13d1   :  { %v1648_v3 = vpop.f32.mrf.mxu1 }
0x13d2   :  { %2230 = vmatmul.mubr.msk.f32.vlgmr.msra.gmra.mxu1 %vm63_vm0, %v1648_v3 }
0x13d3   :  { %v2220_v4 = vpop.f32.mrf.mxu1  ;;  %2240 = vmatprep.mubr.msk.f32.mxu1 %vm2378_vm7, %v2376_v42  ;;  %2233 = vmatpush3.msra.mxu1 %v1739_v5 }
0x13d4   :  { %2234 = vmatprep.subr.mxu1 %v2376_v42 }
0x13d5   :  { %2235 = vmatpush3.msra.mxu1 %v1738_v6 }
0x13d6   :  { %2236 = vmatprep.subr.mxu1 %v2376_v42 }
0x13d7   :  { %2237 = vmatpush3.msra.mxu1 %v1737_v7 }
0x13d8   :  { %2238 = vmatprep.subr.mxu1 %v2376_v42 }
0x13d9   :  { %2239 = vmatpush3.msra.mxu1 %v1736_v8 }
0x1492   :  { %v1731_v10 = vpop.f32.mrf.mxu1 }
0x1493   :  { %v1732_v11 = vadd.f32 %v1971_v9, %v1731_v10 }
0x1494   :  { %v2231_v12 = vpop.f32.mrf.mxu1 }
0x1495   :  { %2310 = vtanh.f32 %v1732_v11 }
0x14a2   :  { %v2311_v13 = vpop.eup %2310 }
0x14a3   :  { %2241 = vmatmul.mubr.msk.f32.vlgmr.msra.gmra.mxu1 %vm63_vm0, %v2311_v13 }
0x1563   :  { %v1814_v17 = vpop.f32.mrf.mxu1 }
0x1564   :  { %v1815_v48 = vadd.f32 %v1973_v31, %v1814_v17 }
0x1565   :  { %v2242_v18 = vpop.f32.mrf.mxu1 }
0x1566   :  { %1818 = vst [vmem:[#allocation5] sm:$0x3] %v1815_v48  ;;  %v1820_v19 = vsel %vm1819_vm12, %v1815_v48, -1e+30  ;;  %v1845_v52 = vmul.f32 %v1976_v43, %v1815_v48 }
0x1567   :  { %v1822_v20 = vsel %vm1821_vm13, %v1820_v19, -inf }
0x1568   :  { %1823 = vmax.xlane.f32.xlu0 %v1822_v20  ;;  %v1846_v54 = vsel %vm1821_vm13, %v1845_v52, 0.0 }
0x156c   :  { %1847 = vadd.xlane.f32.xlu0 %v1846_v54 }
0x15f1   :  { %v1824_v21 = vpop.xlane.xlu0 %1823 }
0x15f2   :  { %v1825_v22 = vsub.f32 %v1820_v19, %v1824_v21 }
0x15f4   :  { %v1826_v23 = vmul.f32 1.442695, %v1825_v22 }
0x15f6   :  { %2312 = vpow2.f32 %v1826_v23 }
0x1603   :  { %v2313_v24 = vpop.eup %2312 }
0x1604   :  { %v1828_v36 = vsel %vm1821_vm13, %v2313_v24, 0.0 }
0x1605   :  { %1829 = vadd.xlane.f32.xlu1 %v1828_v36 }
0x1606   :  { %2339 = shalt.err (!%p2336_p9)
}
0x1607   :  { %1869 = dma.vmem_to_hbm [thread:$0]  %s1867_s5, 32, %s2861_s7, [#allocation3]   ;;  %v1848_v25 = vpop.xlane.xlu0 %1847  ;;  %vm1858_vm14 = vcmask 0  }
0x1608   :  { %s2380_s16 = smov [#allocation6]  }
0x1609   :  { %s1876_s17 = sshll.u32 %s2380_s16, 4  ;;  %s1877_s17 = int_to_ptr.vmem [resolvable:$true] %s1876_s17 }
0x160a   :  { %s2348_s7 = scalar_lea.vmem %s1877_s17, 16  ;;  %s2352_s18 = scalar_lea.vmem %s1877_s17, 32 }
0x160b   :  { %p2349_p10 = scmp.ne.s32.totalorder %s1877_s17, %s2348_s7  ;;  %p2353_p11 = scmp.lt.s32.totalorder %s1877_s17, %s1877_s17 }
0x160c   :  { %p2354_p12 = scmp.lt.s32.totalorder %s2352_s18, %s2348_s7 }
0x160e   :  { %p2355_p13 = por %p2354_p12, %p2353_p11 }
0x1610   :  { %p2356_p0 = pnand %p2355_p13, %p2349_p10 }
0x168e   :  { %v1830_v42 = vpop.xlane.xlu1 %1829 }
0x168f   :  { %2314 = vlog2.f32 %v1830_v42 }
0x169c   :  { %v2315_v57 = vpop.eup %2314 }
0x169d   :  { %v1832_v60 = vmul.f32 0.6931472, %v2315_v57 }
0x169f   :  { %v1833_v59 = vadd.f32 %v1832_v60, %v1824_v21 }
0x16a1   :  { %v1849_v26 = vsub.f32 %v1833_v59, %v1848_v25 }
0x16a3   :  { %v1850_v27 = vsel %vm1821_vm13, %v1849_v26, 0.0 }
0x16a4   :  { %v1851_v28 = vrot.slane %v1850_v27, 4 }
0x16a6   :  { %v1852_v61 = vadd.f32 %v1851_v28, %v1850_v27 }
0x16a8   :  { %v1853_v29 = vrot.slane %v1852_v61, 2 }
0x16aa   :  { %v1854_v30 = vadd.f32 %v1853_v29, %v1852_v61 }
0x16ac   :  { %v1855_v32 = vrot.slane %v1854_v30, 1 }
0x16ae   :  { %v1856_v35 = vadd.f32 %v1855_v32, %v1854_v30 }
0x16b0   :  { %v1857_v37 = vmul.f32 0.5, %v1856_v35 }
0x16b2   :  { %1859 = vst.msk [vmem:[#allocation6] sm:$0x1] %vm1858_vm14, %v1857_v37 }
0x16b3   :  { %2359 = shalt.err (!%p2356_p0)
}
0x16b4   :  { %1879 = dma.vmem_to_hbm [thread:$0]  %s1877_s17, 16, %s2862_s8, [#allocation7]  }
0x16b5   :  { %2370 = dma.done.wait [#allocation3], 32  }
0x16b6   :  { %2371 = vsyncadd [#allocation3], 4294967264 }
0x16b7   :  { %2372 = dma.done.wait [#allocation7], 16  }
0x16b8   :  { %2373 = vsyncadd [#allocation7], 4294967280 }
0x16b9   :  { %1886 = vsyncpa [#allocation3], 1 }
0x16ba   :  { %1887 = vsyncpa [#allocation7], 1 }
0x16bb   :  { %1888 = vsyncpa [#allocation4], 1 }

</bundles_post_ra>
